<compile_context>
chip_gen: v7x
topology: tpu7x:2x2x1
jax: 0.10.0
libtpu: 0.0.40
codegen_flags: <defaults>
</compile_context>

<pallas_src>
import functools

import numpy as np

import jax
import jax.numpy as jnp
from jax.experimental import pallas as pl
from jax.experimental.pallas import tpu as pltpu


_ROW0 = 8  # aligned sublane offset of the first interior row in the padded scratch


def _conv_block_kernel(x_ref, wb1_ref, wb2_ref, selr_ref, selb_ref, o_ref,
                       pad1_ref, pad2_ref, *, H, W, cin, cout,
                       negative_slope, eps):
    """Fused (conv3x3 -> InstanceNorm -> LeakyReLU) x 2 for one batch block.

    x_ref:    (B, H, W*cin)   f32   lane-dense input block
    wb1_ref:  (3, W*cin,  W*cout) bf16  banded layer-1 weights (one per kh)
    wb2_ref:  (3, W*cout, W*cout) bf16  banded layer-2 weights
    selr_ref: (W*cout, cout)  f32   lane -> channel reduction selector
    selb_ref: (cout, W*cout)  f32   channel -> lane broadcast selector
    o_ref:    (B, H, W*cout)  f32   lane-dense output block
    pad1_ref: (B, 8+H+1, W*cin)  bf16 scratch (vertical-padded layer-1 input)
    pad2_ref: (B, 8+H+1, W*cout) bf16 scratch (vertical-padded layer-2 input)
    """
    B = x_ref.shape[0]
    inv_hw = 1.0 / float(H * W)

    # Vertical conv padding: zero only the two border rows (horizontal padding
    # is folded into the banded weights, so no border lanes exist).  Done every
    # step -> no cross-step scratch dependence, batch axis stays "parallel".
    z1 = jnp.zeros((B, 1, W * cin), pad1_ref.dtype)
    z2 = jnp.zeros((B, 1, W * cout), pad2_ref.dtype)
    pad1_ref[:, _ROW0 - 1:_ROW0, :] = z1
    pad1_ref[:, _ROW0 + H:_ROW0 + H + 1, :] = z1
    pad2_ref[:, _ROW0 - 1:_ROW0, :] = z2
    pad2_ref[:, _ROW0 + H:_ROW0 + H + 1, :] = z2

    selr = selr_ref[...]
    selb = selb_ref[...]

    def conv_in_lrelu(pad_ref, wb_ref, b):
        # Conv3x3 as 3 banded matmuls (one per kernel row), f32 accumulation.
        acc = jnp.zeros((H, W * cout), jnp.float32)
        for kh in range(3):
            lhs = pad_ref[b, _ROW0 - 1 + kh:_ROW0 - 1 + kh + H, :]  # (H, W*C) bf16
            acc += jnp.dot(lhs, wb_ref[kh],
                           preferred_element_type=jnp.float32)      # (H, W*cout)

        # InstanceNorm2d (affine=False, biased variance), single-pass stats.
        # Sublane reduce over H, then per-channel reduce via selector matmul
        # (the bulk activation is never relayouted).
        s1 = jnp.sum(acc, axis=0, keepdims=True)                     # (1, W*cout)
        s2 = jnp.sum(acc * acc, axis=0, keepdims=True)               # (1, W*cout)
        s1 = jnp.dot(s1, selr, preferred_element_type=jnp.float32)   # (1, cout)
        s2 = jnp.dot(s2, selr, preferred_element_type=jnp.float32)   # (1, cout)
        mean = s1 * inv_hw
        var = jnp.maximum(s2 * inv_hw - mean * mean, 0.0)
        scale = jax.lax.rsqrt(var + eps)                             # (1, cout)
        shift = mean * scale
        # Broadcast per-channel scale/shift back to the lane-dense layout.
        scale_l = jnp.dot(scale, selb, preferred_element_type=jnp.float32)
        shift_l = jnp.dot(shift, selb, preferred_element_type=jnp.float32)
        z = acc * scale_l - shift_l
        # LeakyReLU(0.2); elementwise math stays f32 (v5e has no bf16 VPU/EUP).
        return jnp.where(z >= 0, z, negative_slope * z)              # (H, W*cout)

    for b in range(B):  # small static batch block, unrolled
        # ---------------- layer 1 ----------------
        # Aligned interior write: sublane offset 8, lane offset 0.
        pad1_ref[b, _ROW0:_ROW0 + H, :] = x_ref[b].astype(pad1_ref.dtype)
        y1 = conv_in_lrelu(pad1_ref, wb1_ref, b)
        # Dropout2d is identity at inference.
        # TODO(synk): training-mode channel dropout (Dropout2d) not implemented.

        # ---------------- layer 2 (intermediate stays in VMEM) ----------------
        pad2_ref[b, _ROW0:_ROW0 + H, :] = y1.astype(pad2_ref.dtype)
        y2 = conv_in_lrelu(pad2_ref, wb2_ref, b)

        o_ref[b] = y2.astype(o_ref.dtype)


def _make_banded_weights(w_hwio, width):
    """(3, 3, Ci, Co) HWIO conv weights -> (3, width*Ci, width*Co) bf16 banded
    matmul weights (one per kernel row).  Horizontal padding=1 is folded in by
    omitting out-of-range taps, so the scratch needs no border lanes."""
    w = np.asarray(w_hwio, dtype=np.float32)
    _, _, ci, co = w.shape
    band = np.zeros((3, width, ci, width, co), np.float32)
    for kh in range(3):
        for kw in range(3):
            for wo in range(width):
                wi = wo + kw - 1  # input column feeding output column `wo`
                if 0 <= wi < width:
                    band[kh, wi, :, wo, :] = w[kh, kw]
    return jnp.asarray(band.reshape(3, width * ci, width * co), jnp.bfloat16)


def _make_channel_selectors(width, co):
    """Lane <-> channel selector matrices for per-channel InstanceNorm stats on
    a lane-dense (H, width*co) activation."""
    lane_c = np.arange(width * co) % co
    sel_red = (lane_c[:, None] == np.arange(co)[None, :]).astype(np.float32)
    return jnp.asarray(sel_red), jnp.asarray(sel_red.T.copy())


def _pick_batch_block(n):
    for bb in (8, 4, 2, 1):
        if n % bb == 0:
            return bb
    return 1


@functools.partial(jax.jit, static_argnames=("negative_slope", "eps"))
def _forward_impl(x_nchw, wb1, wb2, sel_red, sel_bc, *, negative_slope, eps):
    N, cin, H, W = x_nchw.shape
    cout = wb1.shape[2] // W
    bb = _pick_batch_block(N)
    R = _ROW0 + H + 1

    # NCHW -> lane-dense (N, H, W*Cin).
    # TODO(synk): hoist the NCHW<->NHWC transposes to the model boundary when
    # stacking ConvBlocks so intermediate blocks skip them entirely.
    x_flat = jnp.transpose(x_nchw, (0, 2, 3, 1)).reshape(N, H, W * cin)

    kernel = functools.partial(
        _conv_block_kernel, H=H, W=W, cin=cin, cout=cout,
        negative_slope=negative_slope, eps=eps)

    out_flat = pl.pallas_call(
        kernel,
        out_shape=jax.ShapeDtypeStruct((N, H, W * cout), x_nchw.dtype),
        grid_spec=pltpu.PrefetchScalarGridSpec(
            num_scalar_prefetch=0,
            grid=(N // bb,),
            in_specs=[
                pl.BlockSpec((bb, H, W * cin), lambda n: (n, 0, 0)),
                pl.BlockSpec((3, W * cin, W * cout), lambda n: (0, 0, 0)),
                pl.BlockSpec((3, W * cout, W * cout), lambda n: (0, 0, 0)),
                pl.BlockSpec((W * cout, cout), lambda n: (0, 0)),
                pl.BlockSpec((cout, W * cout), lambda n: (0, 0)),
            ],
            out_specs=pl.BlockSpec((bb, H, W * cout), lambda n: (n, 0, 0)),
            scratch_shapes=[
                pltpu.VMEM((bb, R, W * cin), jnp.bfloat16),
                pltpu.VMEM((bb, R, W * cout), jnp.bfloat16),
            ],
        ),
        compiler_params=pltpu.CompilerParams(
            dimension_semantics=("parallel",),
            # Plenty for demo shapes (explicit since v5e's default is 16 MiB).
            # TODO(synk): at real fastMRI sizes, add H-tiling and raise toward
            # ~96 MiB on v5e/v6e (keep <= ~48 MiB on v7x).
            vmem_limit_bytes=32 * 1024 * 1024,
        ),
    )(x_flat, wb1, wb2, sel_red, sel_bc)

    out = out_flat.reshape(N, H, W, cout)
    return jnp.transpose(out, (0, 3, 1, 2))  # back to NCHW


class ConvBlockPallas:
    """JAX/Pallas equivalent of the PyTorch ConvBlock (inference semantics)."""

    def __init__(self, in_chans: int, out_chans: int, drop_prob: float, key):
        self.in_chans = in_chans
        self.out_chans = out_chans
        self.drop_prob = drop_prob  # unused at inference (Dropout2d == identity)

        k1, k2 = jax.random.split(key)
        b1 = (1.0 / (in_chans * 9)) ** 0.5
        b2 = (1.0 / (out_chans * 9)) ** 0.5
        # Weights stored HWIO (3, 3, Ci, Co) f32; banded bf16 forms are cached.
        self.w1 = jax.random.uniform(
            k1, (3, 3, in_chans, out_chans), jnp.float32, -b1, b1)
        self.w2 = jax.random.uniform(
            k2, (3, 3, out_chans, out_chans), jnp.float32, -b2, b2)
        self._prep_cache = {}  # W -> (wb1, wb2, sel_red, sel_bc)

    def _prepared(self, width):
        if width not in self._prep_cache:
            sel_red, sel_bc = _make_channel_selectors(width, self.out_chans)
            self._prep_cache[width] = (
                _make_banded_weights(self.w1, width),
                _make_banded_weights(self.w2, width),
                sel_red, sel_bc)
        return self._prep_cache[width]

    def __call__(self, image_nchw):
        wb1, wb2, sel_red, sel_bc = self._prepared(image_nchw.shape[-1])
        return _forward_impl(image_nchw, wb1, wb2, sel_red, sel_bc,
                             negative_slope=0.2, eps=1e-5)


def _reference_forward(x_nchw, w1_hwio, w2_hwio, *, negative_slope=0.2, eps=1e-5):
    """Pure-JAX f32 reference for validation."""
    def layer(x_nhwc, w):
        y = jax.lax.conv_general_dilated(
            x_nhwc, w, window_strides=(1, 1), padding=((1, 1), (1, 1)),
            dimension_numbers=("NHWC", "HWIO", "NHWC"))
        mean = jnp.mean(y, axis=(1, 2), keepdims=True)
        var = jnp.mean((y - mean) ** 2, axis=(1, 2), keepdims=True)
        y = (y - mean) * jax.lax.rsqrt(var + eps)
        return jnp.where(y >= 0, y, negative_slope * y)

    x = jnp.transpose(x_nchw, (0, 2, 3, 1))
    x = layer(x, w1_hwio)
    x = layer(x, w2_hwio)
    return jnp.transpose(x, (0, 3, 1, 2))


if __name__ == "__main__":
    key = jax.random.PRNGKey(0)
    k_x, k_w = jax.random.split(key)

    N, Cin, Cout, H, W = 2, 4, 8, 16, 16
    x = jax.random.normal(k_x, (N, Cin, H, W), jnp.float32)

    block = ConvBlockPallas(in_chans=Cin, out_chans=Cout, drop_prob=0.1, key=k_w)
    out = jax.block_until_ready(block(x))

    assert out.shape == (N, Cout, H, W), out.shape
    assert bool(jnp.all(jnp.isfinite(out)))

    ref = _reference_forward(x, block.w1, block.w2)
    max_err = float(jnp.max(jnp.abs(out - ref)))
    # bf16 MXU operands + bf16 intermediate scratch -> loosened tolerance
    # vs. the all-f32 reference (outputs are instance-normalized, O(1) scale).
    assert max_err < 0.2, f"max abs err {max_err}"

    print("KERNEL_OK")
</pallas_src>

<mosaic_0001>
module attributes {stable_mosaic.version = 11 : i64} {
  func.func @_conv_block_kernel(%arg0: i32, %arg1: memref<2x16x64xf32, #tpu.memory_space<vmem>>, %arg2: memref<3x64x128xbf16, #tpu.memory_space<vmem>>, %arg3: memref<3x128x128xbf16, #tpu.memory_space<vmem>>, %arg4: memref<128x8xf32, #tpu.memory_space<vmem>>, %arg5: memref<8x128xf32, #tpu.memory_space<vmem>>, %arg6: memref<2x16x128xf32, #tpu.memory_space<vmem>>, %arg7: memref<2x25x64xbf16, #tpu.memory_space<vmem>>, %arg8: memref<2x25x128xbf16, #tpu.memory_space<vmem>>) attributes {dimension_semantics = [#tpu.dimension_semantics<parallel>], iteration_bounds = array<i64: 1>, scalar_prefetch = 0 : i64, scratch_operands = 2 : i64, tpu.core_type = #tpu.core_type<tc>, window_params = [{transform_indices = @transform_0, window_bounds = array<i64: 2, 16, 64>}, {pipeline_mode = #tpu.pipeline_mode<synchronous>, transform_indices = @transform_1, window_bounds = array<i64: 3, 64, 128>}, {pipeline_mode = #tpu.pipeline_mode<synchronous>, transform_indices = @transform_2, window_bounds = array<i64: 3, 128, 128>}, {pipeline_mode = #tpu.pipeline_mode<synchronous>, transform_indices = @transform_3, window_bounds = array<i64: 128, 8>}, {pipeline_mode = #tpu.pipeline_mode<synchronous>, transform_indices = @transform_4, window_bounds = array<i64: 8, 128>}, {transform_indices = @transform_5, window_bounds = array<i64: 2, 16, 128>}]} {
    %cst = arith.constant 0.000000e+00 : bf16
    %0 = vector.broadcast %cst : bf16 to vector<2x1x64xbf16>
    %cst_0 = arith.constant 0.000000e+00 : bf16
    %1 = vector.broadcast %cst_0 : bf16 to vector<2x1x128xbf16>
    %c0 = arith.constant 0 : index
    %c7 = arith.constant 7 : index
    %c0_1 = arith.constant 0 : index
    %2 = vector.load %arg7[%c0, %c7, %c0_1] : memref<2x25x64xbf16, #tpu.memory_space<vmem>>, vector<2x1x64xbf16>
    tpu.vector_store %arg7[%c0, %c7, %c0_1], %0 {strides = array<i32>} : memref<2x25x64xbf16, #tpu.memory_space<vmem>>, vector<2x1x64xbf16>,
    %c0_2 = arith.constant 0 : index
    %c24 = arith.constant 24 : index
    %c0_3 = arith.constant 0 : index
    %3 = vector.load %arg7[%c0_2, %c24, %c0_3] : memref<2x25x64xbf16, #tpu.memory_space<vmem>>, vector<2x1x64xbf16>
    tpu.vector_store %arg7[%c0_2, %c24, %c0_3], %0 {strides = array<i32>} : memref<2x25x64xbf16, #tpu.memory_space<vmem>>, vector<2x1x64xbf16>,
    %c0_4 = arith.constant 0 : index
    %c7_5 = arith.constant 7 : index
    %c0_6 = arith.constant 0 : index
    %4 = vector.load %arg8[%c0_4, %c7_5, %c0_6] : memref<2x25x128xbf16, #tpu.memory_space<vmem>>, vector<2x1x128xbf16>
    tpu.vector_store %arg8[%c0_4, %c7_5, %c0_6], %1 {strides = array<i32>} : memref<2x25x128xbf16, #tpu.memory_space<vmem>>, vector<2x1x128xbf16>,
    %c0_7 = arith.constant 0 : index
    %c24_8 = arith.constant 24 : index
    %c0_9 = arith.constant 0 : index
    %5 = vector.load %arg8[%c0_7, %c24_8, %c0_9] : memref<2x25x128xbf16, #tpu.memory_space<vmem>>, vector<2x1x128xbf16>
    tpu.vector_store %arg8[%c0_7, %c24_8, %c0_9], %1 {strides = array<i32>} : memref<2x25x128xbf16, #tpu.memory_space<vmem>>, vector<2x1x128xbf16>,
    %c0_10 = arith.constant 0 : index
    %c0_11 = arith.constant 0 : index
    %6 = vector.load %arg4[%c0_10, %c0_11] : memref<128x8xf32, #tpu.memory_space<vmem>>, vector<128x8xf32>
    %c0_12 = arith.constant 0 : index
    %c0_13 = arith.constant 0 : index
    %7 = vector.load %arg5[%c0_12, %c0_13] : memref<8x128xf32, #tpu.memory_space<vmem>>, vector<8x128xf32>
    %c0_14 = arith.constant 0 : index
    %c0_15 = arith.constant 0 : index
    %c0_16 = arith.constant 0 : index
    %8 = vector.load %arg1[%c0_14, %c0_15, %c0_16] : memref<2x16x64xf32, #tpu.memory_space<vmem>>, vector<1x16x64xf32>
    %9 = vector.shape_cast %8 : vector<1x16x64xf32> to vector<16x64xf32>
    %10 = arith.truncf %9 : vector<16x64xf32> to vector<16x64xbf16>
    %c0_17 = arith.constant 0 : index
    %c8 = arith.constant 8 : index
    %c0_18 = arith.constant 0 : index
    %11 = vector.load %arg7[%c0_17, %c8, %c0_18] : memref<2x25x64xbf16, #tpu.memory_space<vmem>>, vector<1x16x64xbf16>
    %12 = vector.shape_cast %11 : vector<1x16x64xbf16> to vector<16x64xbf16>
    %13 = vector.shape_cast %10 : vector<16x64xbf16> to vector<1x16x64xbf16>
    tpu.vector_store %arg7[%c0_17, %c8, %c0_18], %13 {strides = array<i32>} : memref<2x25x64xbf16, #tpu.memory_space<vmem>>, vector<1x16x64xbf16>,
    %cst_19 = arith.constant 0.000000e+00 : f32
    %14 = vector.broadcast %cst_19 : f32 to vector<16x128xf32>
    %c0_20 = arith.constant 0 : index
    %c7_21 = arith.constant 7 : index
    %c0_22 = arith.constant 0 : index
    %15 = vector.load %arg7[%c0_20, %c7_21, %c0_22] : memref<2x25x64xbf16, #tpu.memory_space<vmem>>, vector<1x16x64xbf16>
    %16 = vector.shape_cast %15 : vector<1x16x64xbf16> to vector<16x64xbf16>
    %c0_23 = arith.constant 0 : index
    %c0_24 = arith.constant 0 : index
    %c0_25 = arith.constant 0 : index
    %17 = vector.load %arg2[%c0_23, %c0_24, %c0_25] : memref<3x64x128xbf16, #tpu.memory_space<vmem>>, vector<1x64x128xbf16>
    %18 = vector.shape_cast %17 : vector<1x64x128xbf16> to vector<64x128xbf16>
    %cst_26 = arith.constant dense<0.000000e+00> : vector<16x128xf32>
    %19 = tpu.matmul %16, %18, %cst_26 {dimension_numbers = #tpu.dot_dimension_numbers<[1], [0], [0], [1], [0, 0, 1, 1], [], []>} : vector<16x64xbf16>, vector<64x128xbf16>, vector<16x128xf32> -> vector<16x128xf32>
    %20 = arith.addf %14, %19 : vector<16x128xf32>
    %c0_27 = arith.constant 0 : index
    %c8_28 = arith.constant 8 : index
    %c0_29 = arith.constant 0 : index
    %21 = vector.load %arg7[%c0_27, %c8_28, %c0_29] : memref<2x25x64xbf16, #tpu.memory_space<vmem>>, vector<1x16x64xbf16>
    %22 = vector.shape_cast %21 : vector<1x16x64xbf16> to vector<16x64xbf16>
    %c1 = arith.constant 1 : index
    %c0_30 = arith.constant 0 : index
    %c0_31 = arith.constant 0 : index
    %23 = vector.load %arg2[%c1, %c0_30, %c0_31] : memref<3x64x128xbf16, #tpu.memory_space<vmem>>, vector<1x64x128xbf16>
    %24 = vector.shape_cast %23 : vector<1x64x128xbf16> to vector<64x128xbf16>
    %cst_32 = arith.constant dense<0.000000e+00> : vector<16x128xf32>
    %25 = tpu.matmul %22, %24, %cst_32 {dimension_numbers = #tpu.dot_dimension_numbers<[1], [0], [0], [1], [0, 0, 1, 1], [], []>} : vector<16x64xbf16>, vector<64x128xbf16>, vector<16x128xf32> -> vector<16x128xf32>
    %26 = arith.addf %20, %25 : vector<16x128xf32>
    %c0_33 = arith.constant 0 : index
    %c9 = arith.constant 9 : index
    %c0_34 = arith.constant 0 : index
    %27 = vector.load %arg7[%c0_33, %c9, %c0_34] : memref<2x25x64xbf16, #tpu.memory_space<vmem>>, vector<1x16x64xbf16>
    %28 = vector.shape_cast %27 : vector<1x16x64xbf16> to vector<16x64xbf16>
    %c2 = arith.constant 2 : index
    %c0_35 = arith.constant 0 : index
    %c0_36 = arith.constant 0 : index
    %29 = vector.load %arg2[%c2, %c0_35, %c0_36] : memref<3x64x128xbf16, #tpu.memory_space<vmem>>, vector<1x64x128xbf16>
    %30 = vector.shape_cast %29 : vector<1x64x128xbf16> to vector<64x128xbf16>
    %cst_37 = arith.constant dense<0.000000e+00> : vector<16x128xf32>
    %31 = tpu.matmul %28, %30, %cst_37 {dimension_numbers = #tpu.dot_dimension_numbers<[1], [0], [0], [1], [0, 0, 1, 1], [], []>} : vector<16x64xbf16>, vector<64x128xbf16>, vector<16x128xf32> -> vector<16x128xf32>
    %32 = arith.addf %26, %31 : vector<16x128xf32>
    %cst_38 = arith.constant dense<0.000000e+00> : vector<128xf32>
    %33 = vector.multi_reduction <add>, %32, %cst_38 [0] : vector<16x128xf32> to vector<128xf32>
    %34 = vector.shape_cast %33 : vector<128xf32> to vector<1x128xf32>
    %35 = arith.mulf %32, %32 : vector<16x128xf32>
    %cst_39 = arith.constant dense<0.000000e+00> : vector<128xf32>
    %36 = vector.multi_reduction <add>, %35, %cst_39 [0] : vector<16x128xf32> to vector<128xf32>
    %37 = vector.shape_cast %36 : vector<128xf32> to vector<1x128xf32>
    %cst_40 = arith.constant dense<0.000000e+00> : vector<1x8xf32>
    %38 = tpu.matmul %34, %6, %cst_40 {dimension_numbers = #tpu.dot_dimension_numbers<[1], [0], [0], [1], [0, 0, 1, 1], [], []>} : vector<1x128xf32>, vector<128x8xf32>, vector<1x8xf32> -> vector<1x8xf32>
    %cst_41 = arith.constant dense<0.000000e+00> : vector<1x8xf32>
    %39 = tpu.matmul %37, %6, %cst_41 {dimension_numbers = #tpu.dot_dimension_numbers<[1], [0], [0], [1], [0, 0, 1, 1], [], []>} : vector<1x128xf32>, vector<128x8xf32>, vector<1x8xf32> -> vector<1x8xf32>
    %cst_42 = arith.constant 3.906250e-03 : f32
    %40 = vector.broadcast %cst_42 : f32 to vector<1x8xf32>
    %41 = arith.mulf %38, %40 : vector<1x8xf32>
    %cst_43 = arith.constant 3.906250e-03 : f32
    %42 = vector.broadcast %cst_43 : f32 to vector<1x8xf32>
    %43 = arith.mulf %39, %42 : vector<1x8xf32>
    %44 = arith.mulf %41, %41 : vector<1x8xf32>
    %45 = arith.subf %43, %44 : vector<1x8xf32>
    %cst_44 = arith.constant 0.000000e+00 : f32
    %46 = vector.broadcast %cst_44 : f32 to vector<1x8xf32>
    %47 = arith.maximumf %45, %46 : vector<1x8xf32>
    %cst_45 = arith.constant 9.99999974E-6 : f32
    %48 = vector.broadcast %cst_45 : f32 to vector<1x8xf32>
    %49 = arith.addf %47, %48 : vector<1x8xf32>
    %50 = math.rsqrt %49 : vector<1x8xf32>
    %51 = arith.mulf %41, %50 : vector<1x8xf32>
    %cst_46 = arith.constant dense<0.000000e+00> : vector<1x128xf32>
    %52 = tpu.matmul %50, %7, %cst_46 {dimension_numbers = #tpu.dot_dimension_numbers<[1], [0], [0], [1], [0, 0, 1, 1], [], []>} : vector<1x8xf32>, vector<8x128xf32>, vector<1x128xf32> -> vector<1x128xf32>
    %cst_47 = arith.constant dense<0.000000e+00> : vector<1x128xf32>
    %53 = tpu.matmul %51, %7, %cst_47 {dimension_numbers = #tpu.dot_dimension_numbers<[1], [0], [0], [1], [0, 0, 1, 1], [], []>} : vector<1x8xf32>, vector<8x128xf32>, vector<1x128xf32> -> vector<1x128xf32>
    %54 = vector.broadcast %52 : vector<1x128xf32> to vector<16x128xf32>
    %55 = arith.mulf %32, %54 : vector<16x128xf32>
    %56 = vector.broadcast %53 : vector<1x128xf32> to vector<16x128xf32>
    %57 = arith.subf %55, %56 : vector<16x128xf32>
    %cst_48 = arith.constant 0.000000e+00 : f32
    %58 = vector.broadcast %cst_48 : f32 to vector<16x128xf32>
    %59 = arith.cmpf oge, %57, %58 : vector<16x128xf32>
    %cst_49 = arith.constant 2.000000e-01 : f32
    %60 = vector.broadcast %cst_49 : f32 to vector<16x128xf32>
    %61 = arith.mulf %60, %57 : vector<16x128xf32>
    %62 = arith.select %59, %57, %61 : vector<16x128xi1>, vector<16x128xf32>
    %63 = arith.truncf %62 : vector<16x128xf32> to vector<16x128xbf16>
    %c0_50 = arith.constant 0 : index
    %c8_51 = arith.constant 8 : index
    %c0_52 = arith.constant 0 : index
    %64 = vector.load %arg8[%c0_50, %c8_51, %c0_52] : memref<2x25x128xbf16, #tpu.memory_space<vmem>>, vector<1x16x128xbf16>
    %65 = vector.shape_cast %64 : vector<1x16x128xbf16> to vector<16x128xbf16>
    %66 = vector.shape_cast %63 : vector<16x128xbf16> to vector<1x16x128xbf16>
    tpu.vector_store %arg8[%c0_50, %c8_51, %c0_52], %66 {strides = array<i32>} : memref<2x25x128xbf16, #tpu.memory_space<vmem>>, vector<1x16x128xbf16>,
    %cst_53 = arith.constant 0.000000e+00 : f32
    %67 = vector.broadcast %cst_53 : f32 to vector<16x128xf32>
    %c0_54 = arith.constant 0 : index
    %c7_55 = arith.constant 7 : index
    %c0_56 = arith.constant 0 : index
    %68 = vector.load %arg8[%c0_54, %c7_55, %c0_56] : memref<2x25x128xbf16, #tpu.memory_space<vmem>>, vector<1x16x128xbf16>
    %69 = vector.shape_cast %68 : vector<1x16x128xbf16> to vector<16x128xbf16>
    %c0_57 = arith.constant 0 : index
    %c0_58 = arith.constant 0 : index
    %c0_59 = arith.constant 0 : index
    %70 = vector.load %arg3[%c0_57, %c0_58, %c0_59] : memref<3x128x128xbf16, #tpu.memory_space<vmem>>, vector<1x128x128xbf16>
    %71 = vector.shape_cast %70 : vector<1x128x128xbf16> to vector<128x128xbf16>
    %cst_60 = arith.constant dense<0.000000e+00> : vector<16x128xf32>
    %72 = tpu.matmul %69, %71, %cst_60 {dimension_numbers = #tpu.dot_dimension_numbers<[1], [0], [0], [1], [0, 0, 1, 1], [], []>} : vector<16x128xbf16>, vector<128x128xbf16>, vector<16x128xf32> -> vector<16x128xf32>
    %73 = arith.addf %67, %72 : vector<16x128xf32>
    %c0_61 = arith.constant 0 : index
    %c8_62 = arith.constant 8 : index
    %c0_63 = arith.constant 0 : index
    %74 = vector.load %arg8[%c0_61, %c8_62, %c0_63] : memref<2x25x128xbf16, #tpu.memory_space<vmem>>, vector<1x16x128xbf16>
    %75 = vector.shape_cast %74 : vector<1x16x128xbf16> to vector<16x128xbf16>
    %c1_64 = arith.constant 1 : index
    %c0_65 = arith.constant 0 : index
    %c0_66 = arith.constant 0 : index
    %76 = vector.load %arg3[%c1_64, %c0_65, %c0_66] : memref<3x128x128xbf16, #tpu.memory_space<vmem>>, vector<1x128x128xbf16>
    %77 = vector.shape_cast %76 : vector<1x128x128xbf16> to vector<128x128xbf16>
    %cst_67 = arith.constant dense<0.000000e+00> : vector<16x128xf32>
    %78 = tpu.matmul %75, %77, %cst_67 {dimension_numbers = #tpu.dot_dimension_numbers<[1], [0], [0], [1], [0, 0, 1, 1], [], []>} : vector<16x128xbf16>, vector<128x128xbf16>, vector<16x128xf32> -> vector<16x128xf32>
    %79 = arith.addf %73, %78 : vector<16x128xf32>
    %c0_68 = arith.constant 0 : index
    %c9_69 = arith.constant 9 : index
    %c0_70 = arith.constant 0 : index
    %80 = vector.load %arg8[%c0_68, %c9_69, %c0_70] : memref<2x25x128xbf16, #tpu.memory_space<vmem>>, vector<1x16x128xbf16>
    %81 = vector.shape_cast %80 : vector<1x16x128xbf16> to vector<16x128xbf16>
    %c2_71 = arith.constant 2 : index
    %c0_72 = arith.constant 0 : index
    %c0_73 = arith.constant 0 : index
    %82 = vector.load %arg3[%c2_71, %c0_72, %c0_73] : memref<3x128x128xbf16, #tpu.memory_space<vmem>>, vector<1x128x128xbf16>
    %83 = vector.shape_cast %82 : vector<1x128x128xbf16> to vector<128x128xbf16>
    %cst_74 = arith.constant dense<0.000000e+00> : vector<16x128xf32>
    %84 = tpu.matmul %81, %83, %cst_74 {dimension_numbers = #tpu.dot_dimension_numbers<[1], [0], [0], [1], [0, 0, 1, 1], [], []>} : vector<16x128xbf16>, vector<128x128xbf16>, vector<16x128xf32> -> vector<16x128xf32>
    %85 = arith.addf %79, %84 : vector<16x128xf32>
    %cst_75 = arith.constant dense<0.000000e+00> : vector<128xf32>
    %86 = vector.multi_reduction <add>, %85, %cst_75 [0] : vector<16x128xf32> to vector<128xf32>
    %87 = vector.shape_cast %86 : vector<128xf32> to vector<1x128xf32>
    %88 = arith.mulf %85, %85 : vector<16x128xf32>
    %cst_76 = arith.constant dense<0.000000e+00> : vector<128xf32>
    %89 = vector.multi_reduction <add>, %88, %cst_76 [0] : vector<16x128xf32> to vector<128xf32>
    %90 = vector.shape_cast %89 : vector<128xf32> to vector<1x128xf32>
    %cst_77 = arith.constant dense<0.000000e+00> : vector<1x8xf32>
    %91 = tpu.matmul %87, %6, %cst_77 {dimension_numbers = #tpu.dot_dimension_numbers<[1], [0], [0], [1], [0, 0, 1, 1], [], []>} : vector<1x128xf32>, vector<128x8xf32>, vector<1x8xf32> -> vector<1x8xf32>
    %cst_78 = arith.constant dense<0.000000e+00> : vector<1x8xf32>
    %92 = tpu.matmul %90, %6, %cst_78 {dimension_numbers = #tpu.dot_dimension_numbers<[1], [0], [0], [1], [0, 0, 1, 1], [], []>} : vector<1x128xf32>, vector<128x8xf32>, vector<1x8xf32> -> vector<1x8xf32>
    %cst_79 = arith.constant 3.906250e-03 : f32
    %93 = vector.broadcast %cst_79 : f32 to vector<1x8xf32>
    %94 = arith.mulf %91, %93 : vector<1x8xf32>
    %cst_80 = arith.constant 3.906250e-03 : f32
    %95 = vector.broadcast %cst_80 : f32 to vector<1x8xf32>
    %96 = arith.mulf %92, %95 : vector<1x8xf32>
    %97 = arith.mulf %94, %94 : vector<1x8xf32>
    %98 = arith.subf %96, %97 : vector<1x8xf32>
    %cst_81 = arith.constant 0.000000e+00 : f32
    %99 = vector.broadcast %cst_81 : f32 to vector<1x8xf32>
    %100 = arith.maximumf %98, %99 : vector<1x8xf32>
    %cst_82 = arith.constant 9.99999974E-6 : f32
    %101 = vector.broadcast %cst_82 : f32 to vector<1x8xf32>
    %102 = arith.addf %100, %101 : vector<1x8xf32>
    %103 = math.rsqrt %102 : vector<1x8xf32>
    %104 = arith.mulf %94, %103 : vector<1x8xf32>
    %cst_83 = arith.constant dense<0.000000e+00> : vector<1x128xf32>
    %105 = tpu.matmul %103, %7, %cst_83 {dimension_numbers = #tpu.dot_dimension_numbers<[1], [0], [0], [1], [0, 0, 1, 1], [], []>} : vector<1x8xf32>, vector<8x128xf32>, vector<1x128xf32> -> vector<1x128xf32>
    %cst_84 = arith.constant dense<0.000000e+00> : vector<1x128xf32>
    %106 = tpu.matmul %104, %7, %cst_84 {dimension_numbers = #tpu.dot_dimension_numbers<[1], [0], [0], [1], [0, 0, 1, 1], [], []>} : vector<1x8xf32>, vector<8x128xf32>, vector<1x128xf32> -> vector<1x128xf32>
    %107 = vector.broadcast %105 : vector<1x128xf32> to vector<16x128xf32>
    %108 = arith.mulf %85, %107 : vector<16x128xf32>
    %109 = vector.broadcast %106 : vector<1x128xf32> to vector<16x128xf32>
    %110 = arith.subf %108, %109 : vector<16x128xf32>
    %cst_85 = arith.constant 0.000000e+00 : f32
    %111 = vector.broadcast %cst_85 : f32 to vector<16x128xf32>
    %112 = arith.cmpf oge, %110, %111 : vector<16x128xf32>
    %cst_86 = arith.constant 2.000000e-01 : f32
    %113 = vector.broadcast %cst_86 : f32 to vector<16x128xf32>
    %114 = arith.mulf %113, %110 : vector<16x128xf32>
    %115 = arith.select %112, %110, %114 : vector<16x128xi1>, vector<16x128xf32>
    %c0_87 = arith.constant 0 : index
    %c0_88 = arith.constant 0 : index
    %c0_89 = arith.constant 0 : index
    %116 = vector.load %arg6[%c0_87, %c0_88, %c0_89] : memref<2x16x128xf32, #tpu.memory_space<vmem>>, vector<1x16x128xf32>
    %117 = vector.shape_cast %116 : vector<1x16x128xf32> to vector<16x128xf32>
    %118 = vector.shape_cast %115 : vector<16x128xf32> to vector<1x16x128xf32>
    tpu.vector_store %arg6[%c0_87, %c0_88, %c0_89], %118 {strides = array<i32>} : memref<2x16x128xf32, #tpu.memory_space<vmem>>, vector<1x16x128xf32>,
    %c1_90 = arith.constant 1 : index
    %c0_91 = arith.constant 0 : index
    %c0_92 = arith.constant 0 : index
    %119 = vector.load %arg1[%c1_90, %c0_91, %c0_92] : memref<2x16x64xf32, #tpu.memory_space<vmem>>, vector<1x16x64xf32>
    %120 = vector.shape_cast %119 : vector<1x16x64xf32> to vector<16x64xf32>
    %121 = arith.truncf %120 : vector<16x64xf32> to vector<16x64xbf16>
    %c1_93 = arith.constant 1 : index
    %c8_94 = arith.constant 8 : index
    %c0_95 = arith.constant 0 : index
    %122 = vector.load %arg7[%c1_93, %c8_94, %c0_95] : memref<2x25x64xbf16, #tpu.memory_space<vmem>>, vector<1x16x64xbf16>
    %123 = vector.shape_cast %122 : vector<1x16x64xbf16> to vector<16x64xbf16>
    %124 = vector.shape_cast %121 : vector<16x64xbf16> to vector<1x16x64xbf16>
    tpu.vector_store %arg7[%c1_93, %c8_94, %c0_95], %124 {strides = array<i32>} : memref<2x25x64xbf16, #tpu.memory_space<vmem>>, vector<1x16x64xbf16>,
    %cst_96 = arith.constant 0.000000e+00 : f32
    %125 = vector.broadcast %cst_96 : f32 to vector<16x128xf32>
    %c1_97 = arith.constant 1 : index
    %c7_98 = arith.constant 7 : index
    %c0_99 = arith.constant 0 : index
    %126 = vector.load %arg7[%c1_97, %c7_98, %c0_99] : memref<2x25x64xbf16, #tpu.memory_space<vmem>>, vector<1x16x64xbf16>
    %127 = vector.shape_cast %126 : vector<1x16x64xbf16> to vector<16x64xbf16>
    %c0_100 = arith.constant 0 : index
    %c0_101 = arith.constant 0 : index
    %c0_102 = arith.constant 0 : index
    %128 = vector.load %arg2[%c0_100, %c0_101, %c0_102] : memref<3x64x128xbf16, #tpu.memory_space<vmem>>, vector<1x64x128xbf16>
    %129 = vector.shape_cast %128 : vector<1x64x128xbf16> to vector<64x128xbf16>
    %cst_103 = arith.constant dense<0.000000e+00> : vector<16x128xf32>
    %130 = tpu.matmul %127, %129, %cst_103 {dimension_numbers = #tpu.dot_dimension_numbers<[1], [0], [0], [1], [0, 0, 1, 1], [], []>} : vector<16x64xbf16>, vector<64x128xbf16>, vector<16x128xf32> -> vector<16x128xf32>
    %131 = arith.addf %125, %130 : vector<16x128xf32>
    %c1_104 = arith.constant 1 : index
    %c8_105 = arith.constant 8 : index
    %c0_106 = arith.constant 0 : index
    %132 = vector.load %arg7[%c1_104, %c8_105, %c0_106] : memref<2x25x64xbf16, #tpu.memory_space<vmem>>, vector<1x16x64xbf16>
    %133 = vector.shape_cast %132 : vector<1x16x64xbf16> to vector<16x64xbf16>
    %c1_107 = arith.constant 1 : index
    %c0_108 = arith.constant 0 : index
    %c0_109 = arith.constant 0 : index
    %134 = vector.load %arg2[%c1_107, %c0_108, %c0_109] : memref<3x64x128xbf16, #tpu.memory_space<vmem>>, vector<1x64x128xbf16>
    %135 = vector.shape_cast %134 : vector<1x64x128xbf16> to vector<64x128xbf16>
    %cst_110 = arith.constant dense<0.000000e+00> : vector<16x128xf32>
    %136 = tpu.matmul %133, %135, %cst_110 {dimension_numbers = #tpu.dot_dimension_numbers<[1], [0], [0], [1], [0, 0, 1, 1], [], []>} : vector<16x64xbf16>, vector<64x128xbf16>, vector<16x128xf32> -> vector<16x128xf32>
    %137 = arith.addf %131, %136 : vector<16x128xf32>
    %c1_111 = arith.constant 1 : index
    %c9_112 = arith.constant 9 : index
    %c0_113 = arith.constant 0 : index
    %138 = vector.load %arg7[%c1_111, %c9_112, %c0_113] : memref<2x25x64xbf16, #tpu.memory_space<vmem>>, vector<1x16x64xbf16>
    %139 = vector.shape_cast %138 : vector<1x16x64xbf16> to vector<16x64xbf16>
    %c2_114 = arith.constant 2 : index
    %c0_115 = arith.constant 0 : index
    %c0_116 = arith.constant 0 : index
    %140 = vector.load %arg2[%c2_114, %c0_115, %c0_116] : memref<3x64x128xbf16, #tpu.memory_space<vmem>>, vector<1x64x128xbf16>
    %141 = vector.shape_cast %140 : vector<1x64x128xbf16> to vector<64x128xbf16>
    %cst_117 = arith.constant dense<0.000000e+00> : vector<16x128xf32>
    %142 = tpu.matmul %139, %141, %cst_117 {dimension_numbers = #tpu.dot_dimension_numbers<[1], [0], [0], [1], [0, 0, 1, 1], [], []>} : vector<16x64xbf16>, vector<64x128xbf16>, vector<16x128xf32> -> vector<16x128xf32>
    %143 = arith.addf %137, %142 : vector<16x128xf32>
    %cst_118 = arith.constant dense<0.000000e+00> : vector<128xf32>
    %144 = vector.multi_reduction <add>, %143, %cst_118 [0] : vector<16x128xf32> to vector<128xf32>
    %145 = vector.shape_cast %144 : vector<128xf32> to vector<1x128xf32>
    %146 = arith.mulf %143, %143 : vector<16x128xf32>
    %cst_119 = arith.constant dense<0.000000e+00> : vector<128xf32>
    %147 = vector.multi_reduction <add>, %146, %cst_119 [0] : vector<16x128xf32> to vector<128xf32>
    %148 = vector.shape_cast %147 : vector<128xf32> to vector<1x128xf32>
    %cst_120 = arith.constant dense<0.000000e+00> : vector<1x8xf32>
    %149 = tpu.matmul %145, %6, %cst_120 {dimension_numbers = #tpu.dot_dimension_numbers<[1], [0], [0], [1], [0, 0, 1, 1], [], []>} : vector<1x128xf32>, vector<128x8xf32>, vector<1x8xf32> -> vector<1x8xf32>
    %cst_121 = arith.constant dense<0.000000e+00> : vector<1x8xf32>
    %150 = tpu.matmul %148, %6, %cst_121 {dimension_numbers = #tpu.dot_dimension_numbers<[1], [0], [0], [1], [0, 0, 1, 1], [], []>} : vector<1x128xf32>, vector<128x8xf32>, vector<1x8xf32> -> vector<1x8xf32>
    %cst_122 = arith.constant 3.906250e-03 : f32
    %151 = vector.broadcast %cst_122 : f32 to vector<1x8xf32>
    %152 = arith.mulf %149, %151 : vector<1x8xf32>
    %cst_123 = arith.constant 3.906250e-03 : f32
    %153 = vector.broadcast %cst_123 : f32 to vector<1x8xf32>
    %154 = arith.mulf %150, %153 : vector<1x8xf32>
    %155 = arith.mulf %152, %152 : vector<1x8xf32>
    %156 = arith.subf %154, %155 : vector<1x8xf32>
    %cst_124 = arith.constant 0.000000e+00 : f32
    %157 = vector.broadcast %cst_124 : f32 to vector<1x8xf32>
    %158 = arith.maximumf %156, %157 : vector<1x8xf32>
    %cst_125 = arith.constant 9.99999974E-6 : f32
    %159 = vector.broadcast %cst_125 : f32 to vector<1x8xf32>
    %160 = arith.addf %158, %159 : vector<1x8xf32>
    %161 = math.rsqrt %160 : vector<1x8xf32>
    %162 = arith.mulf %152, %161 : vector<1x8xf32>
    %cst_126 = arith.constant dense<0.000000e+00> : vector<1x128xf32>
    %163 = tpu.matmul %161, %7, %cst_126 {dimension_numbers = #tpu.dot_dimension_numbers<[1], [0], [0], [1], [0, 0, 1, 1], [], []>} : vector<1x8xf32>, vector<8x128xf32>, vector<1x128xf32> -> vector<1x128xf32>
    %cst_127 = arith.constant dense<0.000000e+00> : vector<1x128xf32>
    %164 = tpu.matmul %162, %7, %cst_127 {dimension_numbers = #tpu.dot_dimension_numbers<[1], [0], [0], [1], [0, 0, 1, 1], [], []>} : vector<1x8xf32>, vector<8x128xf32>, vector<1x128xf32> -> vector<1x128xf32>
    %165 = vector.broadcast %163 : vector<1x128xf32> to vector<16x128xf32>
    %166 = arith.mulf %143, %165 : vector<16x128xf32>
    %167 = vector.broadcast %164 : vector<1x128xf32> to vector<16x128xf32>
    %168 = arith.subf %166, %167 : vector<16x128xf32>
    %cst_128 = arith.constant 0.000000e+00 : f32
    %169 = vector.broadcast %cst_128 : f32 to vector<16x128xf32>
    %170 = arith.cmpf oge, %168, %169 : vector<16x128xf32>
    %cst_129 = arith.constant 2.000000e-01 : f32
    %171 = vector.broadcast %cst_129 : f32 to vector<16x128xf32>
    %172 = arith.mulf %171, %168 : vector<16x128xf32>
    %173 = arith.select %170, %168, %172 : vector<16x128xi1>, vector<16x128xf32>
    %174 = arith.truncf %173 : vector<16x128xf32> to vector<16x128xbf16>
    %c1_130 = arith.constant 1 : index
    %c8_131 = arith.constant 8 : index
    %c0_132 = arith.constant 0 : index
    %175 = vector.load %arg8[%c1_130, %c8_131, %c0_132] : memref<2x25x128xbf16, #tpu.memory_space<vmem>>, vector<1x16x128xbf16>
    %176 = vector.shape_cast %175 : vector<1x16x128xbf16> to vector<16x128xbf16>
    %177 = vector.shape_cast %174 : vector<16x128xbf16> to vector<1x16x128xbf16>
    tpu.vector_store %arg8[%c1_130, %c8_131, %c0_132], %177 {strides = array<i32>} : memref<2x25x128xbf16, #tpu.memory_space<vmem>>, vector<1x16x128xbf16>,
    %cst_133 = arith.constant 0.000000e+00 : f32
    %178 = vector.broadcast %cst_133 : f32 to vector<16x128xf32>
    %c1_134 = arith.constant 1 : index
    %c7_135 = arith.constant 7 : index
    %c0_136 = arith.constant 0 : index
    %179 = vector.load %arg8[%c1_134, %c7_135, %c0_136] : memref<2x25x128xbf16, #tpu.memory_space<vmem>>, vector<1x16x128xbf16>
    %180 = vector.shape_cast %179 : vector<1x16x128xbf16> to vector<16x128xbf16>
    %c0_137 = arith.constant 0 : index
    %c0_138 = arith.constant 0 : index
    %c0_139 = arith.constant 0 : index
    %181 = vector.load %arg3[%c0_137, %c0_138, %c0_139] : memref<3x128x128xbf16, #tpu.memory_space<vmem>>, vector<1x128x128xbf16>
    %182 = vector.shape_cast %181 : vector<1x128x128xbf16> to vector<128x128xbf16>
    %cst_140 = arith.constant dense<0.000000e+00> : vector<16x128xf32>
    %183 = tpu.matmul %180, %182, %cst_140 {dimension_numbers = #tpu.dot_dimension_numbers<[1], [0], [0], [1], [0, 0, 1, 1], [], []>} : vector<16x128xbf16>, vector<128x128xbf16>, vector<16x128xf32> -> vector<16x128xf32>
    %184 = arith.addf %178, %183 : vector<16x128xf32>
    %c1_141 = arith.constant 1 : index
    %c8_142 = arith.constant 8 : index
    %c0_143 = arith.constant 0 : index
    %185 = vector.load %arg8[%c1_141, %c8_142, %c0_143] : memref<2x25x128xbf16, #tpu.memory_space<vmem>>, vector<1x16x128xbf16>
    %186 = vector.shape_cast %185 : vector<1x16x128xbf16> to vector<16x128xbf16>
    %c1_144 = arith.constant 1 : index
    %c0_145 = arith.constant 0 : index
    %c0_146 = arith.constant 0 : index
    %187 = vector.load %arg3[%c1_144, %c0_145, %c0_146] : memref<3x128x128xbf16, #tpu.memory_space<vmem>>, vector<1x128x128xbf16>
    %188 = vector.shape_cast %187 : vector<1x128x128xbf16> to vector<128x128xbf16>
    %cst_147 = arith.constant dense<0.000000e+00> : vector<16x128xf32>
    %189 = tpu.matmul %186, %188, %cst_147 {dimension_numbers = #tpu.dot_dimension_numbers<[1], [0], [0], [1], [0, 0, 1, 1], [], []>} : vector<16x128xbf16>, vector<128x128xbf16>, vector<16x128xf32> -> vector<16x128xf32>
    %190 = arith.addf %184, %189 : vector<16x128xf32>
    %c1_148 = arith.constant 1 : index
    %c9_149 = arith.constant 9 : index
    %c0_150 = arith.constant 0 : index
    %191 = vector.load %arg8[%c1_148, %c9_149, %c0_150] : memref<2x25x128xbf16, #tpu.memory_space<vmem>>, vector<1x16x128xbf16>
    %192 = vector.shape_cast %191 : vector<1x16x128xbf16> to vector<16x128xbf16>
    %c2_151 = arith.constant 2 : index
    %c0_152 = arith.constant 0 : index
    %c0_153 = arith.constant 0 : index
    %193 = vector.load %arg3[%c2_151, %c0_152, %c0_153] : memref<3x128x128xbf16, #tpu.memory_space<vmem>>, vector<1x128x128xbf16>
    %194 = vector.shape_cast %193 : vector<1x128x128xbf16> to vector<128x128xbf16>
    %cst_154 = arith.constant dense<0.000000e+00> : vector<16x128xf32>
    %195 = tpu.matmul %192, %194, %cst_154 {dimension_numbers = #tpu.dot_dimension_numbers<[1], [0], [0], [1], [0, 0, 1, 1], [], []>} : vector<16x128xbf16>, vector<128x128xbf16>, vector<16x128xf32> -> vector<16x128xf32>
    %196 = arith.addf %190, %195 : vector<16x128xf32>
    %cst_155 = arith.constant dense<0.000000e+00> : vector<128xf32>
    %197 = vector.multi_reduction <add>, %196, %cst_155 [0] : vector<16x128xf32> to vector<128xf32>
    %198 = vector.shape_cast %197 : vector<128xf32> to vector<1x128xf32>
    %199 = arith.mulf %196, %196 : vector<16x128xf32>
    %cst_156 = arith.constant dense<0.000000e+00> : vector<128xf32>
    %200 = vector.multi_reduction <add>, %199, %cst_156 [0] : vector<16x128xf32> to vector<128xf32>
    %201 = vector.shape_cast %200 : vector<128xf32> to vector<1x128xf32>
    %cst_157 = arith.constant dense<0.000000e+00> : vector<1x8xf32>
    %202 = tpu.matmul %198, %6, %cst_157 {dimension_numbers = #tpu.dot_dimension_numbers<[1], [0], [0], [1], [0, 0, 1, 1], [], []>} : vector<1x128xf32>, vector<128x8xf32>, vector<1x8xf32> -> vector<1x8xf32>
    %cst_158 = arith.constant dense<0.000000e+00> : vector<1x8xf32>
    %203 = tpu.matmul %201, %6, %cst_158 {dimension_numbers = #tpu.dot_dimension_numbers<[1], [0], [0], [1], [0, 0, 1, 1], [], []>} : vector<1x128xf32>, vector<128x8xf32>, vector<1x8xf32> -> vector<1x8xf32>
    %cst_159 = arith.constant 3.906250e-03 : f32
    %204 = vector.broadcast %cst_159 : f32 to vector<1x8xf32>
    %205 = arith.mulf %202, %204 : vector<1x8xf32>
    %cst_160 = arith.constant 3.906250e-03 : f32
    %206 = vector.broadcast %cst_160 : f32 to vector<1x8xf32>
    %207 = arith.mulf %203, %206 : vector<1x8xf32>
    %208 = arith.mulf %205, %205 : vector<1x8xf32>
    %209 = arith.subf %207, %208 : vector<1x8xf32>
    %cst_161 = arith.constant 0.000000e+00 : f32
    %210 = vector.broadcast %cst_161 : f32 to vector<1x8xf32>
    %211 = arith.maximumf %209, %210 : vector<1x8xf32>
    %cst_162 = arith.constant 9.99999974E-6 : f32
    %212 = vector.broadcast %cst_162 : f32 to vector<1x8xf32>
    %213 = arith.addf %211, %212 : vector<1x8xf32>
    %214 = math.rsqrt %213 : vector<1x8xf32>
    %215 = arith.mulf %205, %214 : vector<1x8xf32>
    %cst_163 = arith.constant dense<0.000000e+00> : vector<1x128xf32>
    %216 = tpu.matmul %214, %7, %cst_163 {dimension_numbers = #tpu.dot_dimension_numbers<[1], [0], [0], [1], [0, 0, 1, 1], [], []>} : vector<1x8xf32>, vector<8x128xf32>, vector<1x128xf32> -> vector<1x128xf32>
    %cst_164 = arith.constant dense<0.000000e+00> : vector<1x128xf32>
    %217 = tpu.matmul %215, %7, %cst_164 {dimension_numbers = #tpu.dot_dimension_numbers<[1], [0], [0], [1], [0, 0, 1, 1], [], []>} : vector<1x8xf32>, vector<8x128xf32>, vector<1x128xf32> -> vector<1x128xf32>
    %218 = vector.broadcast %216 : vector<1x128xf32> to vector<16x128xf32>
    %219 = arith.mulf %196, %218 : vector<16x128xf32>
    %220 = vector.broadcast %217 : vector<1x128xf32> to vector<16x128xf32>
    %221 = arith.subf %219, %220 : vector<16x128xf32>
    %cst_165 = arith.constant 0.000000e+00 : f32
    %222 = vector.broadcast %cst_165 : f32 to vector<16x128xf32>
    %223 = arith.cmpf oge, %221, %222 : vector<16x128xf32>
    %cst_166 = arith.constant 2.000000e-01 : f32
    %224 = vector.broadcast %cst_166 : f32 to vector<16x128xf32>
    %225 = arith.mulf %224, %221 : vector<16x128xf32>
    %226 = arith.select %223, %221, %225 : vector<16x128xi1>, vector<16x128xf32>
    %c1_167 = arith.constant 1 : index
    %c0_168 = arith.constant 0 : index
    %c0_169 = arith.constant 0 : index
    %227 = vector.load %arg6[%c1_167, %c0_168, %c0_169] : memref<2x16x128xf32, #tpu.memory_space<vmem>>, vector<1x16x128xf32>
    %228 = vector.shape_cast %227 : vector<1x16x128xf32> to vector<16x128xf32>
    %229 = vector.shape_cast %226 : vector<16x128xf32> to vector<1x16x128xf32>
    tpu.vector_store %arg6[%c1_167, %c0_168, %c0_169], %229 {strides = array<i32>} : memref<2x16x128xf32, #tpu.memory_space<vmem>>, vector<1x16x128xf32>,
    return
  }
  func.func @transform_0(%arg0: i32) -> (i32, i32, i32) {
    %c0_i32 = arith.constant 0 : i32
    %c0_i32_0 = arith.constant 0 : i32
    %c0_i32_1 = arith.constant 0 : i32
    return %arg0, %c0_i32, %c0_i32_0 : i32, i32, i32
  }
  func.func @transform_1(%arg0: i32) -> (i32, i32, i32) {
    %c0_i32 = arith.constant 0 : i32
    %c0_i32_0 = arith.constant 0 : i32
    %c0_i32_1 = arith.constant 0 : i32
    %c0_i32_2 = arith.constant 0 : i32
    return %c0_i32, %c0_i32_0, %c0_i32_1 : i32, i32, i32
  }
  func.func @transform_2(%arg0: i32) -> (i32, i32, i32) {
    %c0_i32 = arith.constant 0 : i32
    %c0_i32_0 = arith.constant 0 : i32
    %c0_i32_1 = arith.constant 0 : i32
    %c0_i32_2 = arith.constant 0 : i32
    return %c0_i32, %c0_i32_0, %c0_i32_1 : i32, i32, i32
  }
  func.func @transform_3(%arg0: i32) -> (i32, i32) {
    %c0_i32 = arith.constant 0 : i32
    %c0_i32_0 = arith.constant 0 : i32
    %c0_i32_1 = arith.constant 0 : i32
    return %c0_i32, %c0_i32_0 : i32, i32
  }
  func.func @transform_4(%arg0: i32) -> (i32, i32) {
    %c0_i32 = arith.constant 0 : i32
    %c0_i32_0 = arith.constant 0 : i32
    %c0_i32_1 = arith.constant 0 : i32
    return %c0_i32, %c0_i32_0 : i32, i32
  }
  func.func @transform_5(%arg0: i32) -> (i32, i32, i32) {
    %c0_i32 = arith.constant 0 : i32
    %c0_i32_0 = arith.constant 0 : i32
    %c0_i32_1 = arith.constant 0 : i32
    return %arg0, %c0_i32, %c0_i32_0 : i32, i32, i32
  }
}

</mosaic_0001>

<bundles_post_ra>
// kernel: _forward_impl.1
= control target key start
LH: loop header
LB: loop body
LE: loop exit
PB: predicated region body
PF: predicated region fallthrough
CT: control target
= control target key end

     0   :  { %v4055_v0 = vmov 0.0   ;;  %vm4056_vm0 = vmmov 0   ;;  %vm21_vm1 = vcmask 519171   ;;  %vm22_vm2 = vsmask.f32 7950  ;;  %s4774_s1 = inlined_call_operand.vmem [shape: bf16[3,64,128], index: 1, kind: input, shape index: {}]   ;;  %s4775_s0 = inlined_call_operand.vmem [shape: f32[2,16,64], index: 0, kind: input, shape index: {}]   ;;  %s4776_s3 = inlined_call_operand.vmem [shape: f32[128,8], index: 3, kind: input, shape index: {}]   ;;  %s4777_s4 = inlined_call_operand.vmem [shape: f32[8,128], index: 4, kind: input, shape index: {}]   ;;  %s4778_s2 = inlined_call_operand.vmem [shape: bf16[3,128,128], index: 2, kind: input, shape index: {}]   ;;  %s4779_s5 = inlined_call_operand.vmem [shape: f32[2,16,128], index: 5, kind: output, shape index: {}]  }
   0x1   :  { %3215 = vmatprep.subr.bf16.mxu0 %v4055_v0  ;;  %v3954_v1 = vld [vmem:[%s4774_s1 + $0x20] sm:$0xff]   ;;  %3223 = vmatprep.mubr.msk.bf16.mxu0 %vm4056_vm0, %v4055_v0  ;;  %v3955_v2 = vld [vmem:[%s4774_s1 + $0x28] sm:$0xff]   ;;  %vm23_vm3 = vmand %vm21_vm1, %vm22_vm2  ;;  %vm82_vm4 = vcmask 519168   ;;  %v4057_v5 = vmov 0.0|0.0   ;;  %vm30_vm5 = vcmask 516096   ;;  %vm134_vm7 = vcmask 523264  }
   0x2   :  { %3283 = vmatprep.mubr.msk.f32.mxu1 %vm4056_vm0, %v4055_v0  ;;  %3216 = vmatpush3.bf16.msra.mxu0 %v3954_v1  ;;  %v24_v3 = vld [vmem:[#allocation2] sm:$0x8]  ;;  %v27_v4 = vld [vmem:[#allocation2 + $0x10] sm:$0x8]  ;;  %v73_v9 = vld [vmem:[%s4775_s0 + $0x8] sm:$0xff]  ;;  %vm536_vm11 = vcmask 64512  }
   0x3   :  { %3217 = vmatprep.subr.bf16.mxu0 %v4055_v0  ;;  %3727 = vmatprep.subr.bf16.mxu1 %v4057_v5  ;;  %v25_v6 = vsel %vm23_vm3, 0, %v24_v3  ;;  %v28_v7 = vsel %vm23_vm3, 0, %v27_v4  ;;  %v72_v8 = vld [vmem:[%s4775_s0] sm:$0xff]  ;;  %v3956_v10 = vld [vmem:[%s4774_s1 + $0x30] sm:$0xff]   ;;  %v2972_v12 = vpack.c.bf16 %v73_v9, %v73_v9  ;;  %v3957_v13 = vld [vmem:[%s4774_s1 + $0x38] sm:$0xff]   ;;  %vm39_vm12 = vcmask 1043459  }
   0x4   :  { %26 = vst [vmem:[#allocation2] sm:$0x8] %v25_v6  ;;  %29 = vst [vmem:[#allocation2 + $0x10] sm:$0x8] %v28_v7  ;;  %v2971_v11 = vpack.c.bf16 %v72_v8, %v72_v8  ;;  %v3961_v15 = vld [vmem:[%s4774_s1] sm:$0xff]   ;;  %v56_v25 = vld [vmem:[%s4776_s3 + $0x8] sm:$0xff] }
   0x5   :  { %84 = vst.msk [vmem:[#allocation2 + $0x8] sm:$0xf] %vm82_vm4, %v2972_v12  ;;  %vm31_vm6 = vsmask.f32 256  ;;  %v33_v16 = vld [vmem:[#allocation2 + $0xc] sm:$0x1]  ;;  %vm4334_vm13 = vmand %vm39_vm12, %vm22_vm2 }
   0x6   :  { %3218 = vmatpush3.bf16.msra.mxu0 %v3955_v2  ;;  %83 = vst.msk [vmem:[#allocation2 + $0x4] sm:$0xf] %vm82_vm4, %v2971_v11  ;;  %vm4123_vm8 = vmand %vm30_vm5, %vm31_vm6  ;;  %v55_v24 = vld [vmem:[%s4776_s3] sm:$0xff]  ;;  %v57_v30 = vld [vmem:[%s4776_s3 + $0x10] sm:$0xff]  ;;  %vm183_vm9 = vsmask.f32 4352 }
   0x7   :  { %3219 = vmatprep.subr.bf16.mxu0 %v4055_v0  ;;  %v34_v23 = vsel %vm4123_vm8, 0, %v33_v16  ;;  %v58_v31 = vld [vmem:[%s4776_s3 + $0x18] sm:$0xff]  ;;  %v3962_v32 = vld [vmem:[%s4774_s1 + $0x8] sm:$0xff]   ;;  %v4147_v33 = vpack.c.bf16 %v56_v25, %v55_v24  ;;  %v59_v36 = vld [vmem:[%s4776_s3 + $0x20] sm:$0xff]  ;;  %vm289_vm10 = vsmask.f32 7424 }
   0x8   :  { %35 = vst [vmem:[#allocation2 + $0xc] sm:$0x1] %v34_v23  ;;  %v60_v37 = vld [vmem:[%s4776_s3 + $0x28] sm:$0xff]  ;;  %v3963_v40 = vld [vmem:[%s4774_s1 + $0x10] sm:$0xff]   ;;  %v4160_v41 = vpack.c.bf16 %v58_v31, %v57_v30  ;;  %v3964_v43 = vld [vmem:[%s4774_s1 + $0x18] sm:$0xff]   ;;  %vm47_vm14 = vcmask 1040384  }
   0x9   :  { %3729 = vmatpush3.bf16.msra.mxu1 %v4147_v33  ;;  %v61_v42 = vld [vmem:[%s4776_s3 + $0x30] sm:$0xff]  ;;  %v4171_v44 = vpack.c.bf16 %v60_v37, %v59_v36  ;;  %v62_v45 = vld [vmem:[%s4776_s3 + $0x38] sm:$0xff]  ;;  %v3965_v50 = vld [vmem:[%s4774_s1 + $0x40] sm:$0xff]  }
   0xa   :  { %3220 = vmatpush3.bf16.msra.mxu0 %v3956_v10  ;;  %3730 = vmatprep.subr.bf16.mxu1 %v4057_v5  ;;  %v4179_v48 = vpack.c.bf16 %v62_v45, %v61_v42  ;;  %v3966_v52 = vld [vmem:[%s4774_s1 + $0x48] sm:$0xff]   ;;  %v3967_v55 = vld [vmem:[%s4774_s1 + $0x50] sm:$0xff]   ;;  %v3968_v59 = vld [vmem:[%s4774_s1 + $0x58] sm:$0xff]  }
   0xb   :  { %3221 = vmatprep.subr.bf16.mxu0 %v4055_v0  ;;  %v85_v14 = vld [vmem:[#allocation2] sm:$0x8]  ;;  %v64_v1 = vld [vmem:[%s4776_s3 + $0x48] sm:$0xff]  ;;  %v65_v3 = vld [vmem:[%s4776_s3 + $0x50] sm:$0xff] }
   0xc   :  { %v87_v18 = vld [vmem:[#allocation2 + $0x8] sm:$0xf]  ;;  %v63_v63 = vld [vmem:[%s4776_s3 + $0x40] sm:$0xff]  ;;  %v66_v4 = vld [vmem:[%s4776_s3 + $0x58] sm:$0xff] }
   0xd   :  { %v86_v17 = vld [vmem:[#allocation2 + $0x4] sm:$0xf]  ;;  %v2774_v22 = vcombine.low %v87_v18, %v87_v18  ;;  %3732 = vmatpush3.bf16.msra.mxu1 %v4160_v41  ;;  %v4215_v2 = vpack.c.bf16 %v64_v1, %v63_v63  ;;  %v4225_v6 = vpack.c.bf16 %v66_v4, %v65_v3  ;;  %v68_v8 = vld [vmem:[%s4776_s3 + $0x68] sm:$0xff]  ;;  %v69_v10 = vld [vmem:[%s4776_s3 + $0x70] sm:$0xff]  ;;  %v683_v3 = vlaneseq }
   0xe   :  { %3222 = vmatpush3.bf16.msra.mxu0 %v3957_v13  ;;  %v2767_v20 = vcombine.low %v86_v17, %v87_v18  ;;  %v2773_v21 = vcombine.low %v85_v14, %v86_v17  ;;  %3733 = vmatprep.subr.bf16.mxu1 %v4057_v5  ;;  %v3969_v51 = vld [vmem:[#allocation2 + $0x4] sm:$0xff]   ;;  %v70_v11 = vld [vmem:[%s4776_s3 + $0x78] sm:$0xff]  ;;  %vm4345_vm15 = vmand %vm47_vm14, %vm31_vm6 }
   0xf   :  { %3227 = vmatprep.subr.bf16.mxu0 %v4055_v0  ;;  %v193_v28 = vshrl.u32 %v2774_v22, 16  ;;  %v196_v29 = vshll.u32 %v2774_v22, 16  ;;  %v3970_v53 = vld [vmem:[#allocation2 + $0xc] ss:$0 sps:$4 sm:$0x11]   ;;  %v293_v54 = vshll.u32 %v3969_v51, 16  ;;  %v4245_v12 = vpack.c.bf16 %v70_v11, %v69_v10 }
  0x10   :  { %v185_v26 = vshrl.u32 %v2773_v21, 16  ;;  %v188_v27 = vshll.u32 %v2773_v21, 16  ;;  %v291_v56 = vshrl.u32 %v3969_v51, 16  ;;  %v298_v58 = vshll.u32 %v3970_v53, 16  ;;  %v67_v7 = vld [vmem:[%s4776_s3 + $0x60] sm:$0xff]  ;;  %v3973_v53 = vld [vmem:[%s4778_s2 + $0x50] sm:$0xff]  }
  0x11   :  { %3224 = vmatmul.mubr.msk.bf16.vlgmr.msra.gmra.mrb[0].mxu0 %vm134_vm7, %v2767_v20  ;;  %v195_v38 = vrot.slane %v193_v28, 3  ;;  %v198_v39 = vrot.slane %v196_v29, 4  ;;  %3735 = vmatpush3.bf16.msra.mxu1 %v4171_v44  ;;  %v295_v57 = vrot.slane %v293_v54, 1  ;;  %v4235_v9 = vpack.c.bf16 %v68_v8, %v67_v7  ;;  %v3974_v54 = vld [vmem:[%s4778_s2 + $0x58] sm:$0xff]   ;;  %v4000_v19 = vld [vmem:[%s4774_s1 + $0x20] sm:$0xff]  }
  0x12   :  { %3228 = vmatpush3.bf16.msra.mxu0 %v3961_v15  ;;  %3235 = vmatprep.mubr.msk.bf16.mxu0 %vm4056_vm0, %v4055_v0  ;;  %v187_v34 = vrot.slane %v185_v26, 3  ;;  %v190_v35 = vrot.slane %v188_v27, 4  ;;  %v300_v61 = vrot.slane %v298_v58, 1  ;;  %v41_v58 = vld [vmem:[#allocation3] sm:$0x8]  ;;  %v3978_v63 = vld [vmem:[%s4778_s2 + $0x78] sm:$0xff]  }
  0x13   :  { %3229 = vmatprep.subr.bf16.mxu0 %v4055_v0  ;;  %v199_v47 = vor.u32 %v198_v39, %v195_v38  ;;  %3736 = vmatprep.subr.bf16.mxu1 %v4057_v5  ;;  %v296_v60 = vor.u32 %v295_v57, %v291_v56  ;;  %v3976_v56 = vld [vmem:[%s4778_s2 + $0x68] sm:$0xff]   ;;  %v684_v4 = vshrl.u32 %v683_v3, 7 }
  0x14   :  { %v191_v46 = vor.u32 %v190_v35, %v187_v34  ;;  %v4282_v35 = vld [vmem:[%s4777_s4] sm:$0xff]  ;;  %v3995_v3 = vld [vmem:[%s4778_s2 + $0xa8] sm:$0xff]  }
  0x15   :  { %3738 = vmatpush3.bf16.msra.mxu1 %v4179_v48  ;;  %v301_v62 = vsel %vm289_vm10, %v296_v60, %v300_v61  ;;  %v3977_v60 = vld [vmem:[%s4778_s2 + $0x70] sm:$0xff]   ;;  %v4356_v7 = vsub.s32 0, %v684_v4 }
  0x16   :  { %3230 = vmatpush3.bf16.msra.mxu0 %v3962_v32  ;;  %v200_v49 = vsel %vm183_vm9, %v191_v46, %v199_v47  ;;  %3739 = vmatprep.subr.bf16.mxu1 %v4057_v5 }
  0x17   :  { %3231 = vmatprep.subr.bf16.mxu0 %v4055_v0 }
  0x19   :  { %3741 = vmatpush3.bf16.msra.mxu1 %v4215_v2 }
  0x1a   :  { %3232 = vmatpush3.bf16.msra.mxu0 %v3963_v40  ;;  %3742 = vmatprep.subr.bf16.mxu1 %v4057_v5 }
  0x1b   :  { %3233 = vmatprep.subr.bf16.mxu0 %v4055_v0 }
  0x1d   :  { %3744 = vmatpush3.bf16.msra.mxu1 %v4225_v6 }
  0x1e   :  { %3234 = vmatpush3.bf16.msra.mxu0 %v3964_v43  ;;  %3745 = vmatprep.subr.bf16.mxu1 %v4057_v5 }
  0x1f   :  { %3239 = vmatprep.subr.bf16.mxu0 %v4055_v0 }
  0x21   :  { %3236 = vmatmul.mubr.msk.bf16.vlgmr.msra.gmra.mrb[0].mxu0 %vm134_vm7, %v200_v49  ;;  %3747 = vmatpush3.bf16.msra.mxu1 %v4235_v9 }
  0x22   :  { %3240 = vmatpush3.bf16.msra.mxu0 %v3965_v50  ;;  %3247 = vmatprep.mubr.msk.bf16.mxu0 %vm4056_vm0, %v4055_v0  ;;  %v3971_v50 = vld [vmem:[%s4778_s2 + $0x40] sm:$0xff]  }
  0x23   :  { %3241 = vmatprep.subr.bf16.mxu0 %v4055_v0  ;;  %3748 = vmatprep.subr.bf16.mxu1 %v4057_v5 }
  0x25   :  { %3750 = vmatpush3.bf16.msra.mxu1 %v4245_v12 }
  0x26   :  { %3242 = vmatpush3.bf16.msra.mxu0 %v3966_v52  ;;  %3751 = vmatprep.subr.bf16.mxu1 %v4057_v5  ;;  %v3972_v52 = vld [vmem:[%s4778_s2 + $0x48] sm:$0xff]  }
  0x27   :  { %3243 = vmatprep.subr.bf16.mxu0 %v4055_v0 }
  0x2a   :  { %3244 = vmatpush3.bf16.msra.mxu0 %v3967_v55  ;;  %v3975_v55 = vld [vmem:[%s4778_s2 + $0x60] sm:$0xff]  }
  0x2b   :  { %3245 = vmatprep.subr.bf16.mxu0 %v4055_v0 }
  0x2e   :  { %3246 = vmatpush3.bf16.msra.mxu0 %v3968_v59  ;;  %v42_v59 = vsel %vm4334_vm13, 0, %v41_v58 }
  0x2f   :  { %3326 = vmatprep.subr.mxu0 %v4055_v0  ;;  %43 = vst [vmem:[#allocation3] sm:$0x8] %v42_v59  ;;  %v3991_v59 = vld [vmem:[%s4778_s2 + $0x88] sm:$0xff]  }
  0x31   :  { %3248 = vmatmul.mubr.msk.bf16.vlgmr.msra.gmra.mrb[0].mxu0 %vm134_vm7, %v301_v62  ;;  %v49_v62 = vld [vmem:[#allocation3 + $0xc] sm:$0x1] }
  0x32   :  { %3328 = vmatprep.mubr.msk.f32.mxu0 %vm4056_vm0, %v4055_v0  ;;  %3327 = vmatpush3.msra.mxu0 %v4282_v35  ;;  %v50_v1 = vsel %vm4345_vm15, 0, %v49_v62  ;;  %v3993_v62 = vld [vmem:[%s4778_s2 + $0x98] sm:$0xff]  }
  0x33   :  { %3331 = vmatprep.subr.bf16.mxu0 %v4055_v0  ;;  %51 = vst [vmem:[#allocation3 + $0xc] sm:$0x1] %v50_v1 }
  0x3a   :  { %v3999_v4 = vld [vmem:[#allocation3 + $0xc] ss:$0 sps:$4 sm:$0x11]  }
 0x104   :  { %v4249_v13 = vpop.f32.mrb[0].mxu0 }
 0x105   :  { %v3249_v14 = vpop.f32.mrb[1].mxu0  ;;  %v379_v16 = vmul.f32 %v4249_v13, %v4249_v13 }
 0x106   :  { %v4251_v15 = vpop.f32.mrb[2].mxu0 }
 0x107   :  { %v372_v17 = vadd.f32 %v4251_v15, %v4249_v13  ;;  %v380_v18 = vmul.f32 %v4251_v15, %v4251_v15  ;;  %v3250_v20 = vpop.f32.mrb[3].mxu0 }
 0x109   :  { %v373_v21 = vrot.slane %v372_v17, 4  ;;  %v381_v22 = vadd.f32 %v380_v18, %v379_v16 }
 0x10b   :  { %v374_v23 = vadd.f32 %v373_v21, %v372_v17  ;;  %v382_v28 = vrot.slane %v381_v22, 4 }
 0x10d   :  { %v375_v24 = vrot.slane %v374_v23, 2  ;;  %v383_v29 = vadd.f32 %v382_v28, %v381_v22 }
 0x10f   :  { %v376_v25 = vadd.f32 %v375_v24, %v374_v23  ;;  %v384_v30 = vrot.slane %v383_v29, 2 }
 0x111   :  { %v377_v26 = vrot.slane %v376_v25, 1  ;;  %v385_v31 = vadd.f32 %v384_v30, %v383_v29 }
 0x113   :  { %v378_v27 = vadd.f32 %v377_v26, %v376_v25  ;;  %v386_v32 = vrot.slane %v385_v31, 1 }
 0x115   :  { %3284 = vmatmul.mubr.f32.vlgmr.msra.gmra.mrb[0].mxu1 %v378_v27  ;;  %v387_v34 = vadd.f32 %v386_v32, %v385_v31  ;;  %v3983_v31 = vld [vmem:[%s4778_s2 + $0x8] sm:$0xff]   ;;  %v3984_v32 = vld [vmem:[%s4778_s2 + $0x10] sm:$0xff]  }
 0x116   :  { %3753 = vmatpush3.bf16.msra.mxu1 %v4147_v33  ;;  %3318 = vmatprep.mubr.msk.f32.mxu1 %vm4056_vm0, %v4055_v0 }
 0x117   :  { %3754 = vmatprep.subr.bf16.mxu1 %v4057_v5 }
 0x11a   :  { %3756 = vmatpush3.bf16.msra.mxu1 %v4160_v41 }
 0x11b   :  { %3757 = vmatprep.subr.bf16.mxu1 %v4057_v5 }
 0x11e   :  { %3759 = vmatpush3.bf16.msra.mxu1 %v4171_v44 }
 0x11f   :  { %3760 = vmatprep.subr.bf16.mxu1 %v4057_v5 }
 0x122   :  { %3762 = vmatpush3.bf16.msra.mxu1 %v4179_v48 }
 0x123   :  { %3763 = vmatprep.subr.bf16.mxu1 %v4057_v5 }
 0x126   :  { %3765 = vmatpush3.bf16.msra.mxu1 %v4215_v2 }
 0x127   :  { %3766 = vmatprep.subr.bf16.mxu1 %v4057_v5 }
 0x12a   :  { %3768 = vmatpush3.bf16.msra.mxu1 %v4225_v6 }
 0x12b   :  { %3769 = vmatprep.subr.bf16.mxu1 %v4057_v5 }
 0x12e   :  { %3771 = vmatpush3.bf16.msra.mxu1 %v4235_v9 }
 0x12f   :  { %3772 = vmatprep.subr.bf16.mxu1 %v4057_v5 }
 0x132   :  { %3774 = vmatpush3.bf16.msra.mxu1 %v4245_v12 }
 0x133   :  { %3321 = vmatprep.subr.mxu1 %v4055_v0 }
 0x135   :  { %3319 = vmatmul.mubr.f32.vlgmr.msra.gmra.mrb[2].mxu1 %v387_v34  ;;  %v3985_v34 = vld [vmem:[%s4778_s2 + $0x18] sm:$0xff]  }
 0x136   :  { %3323 = vmatprep.mubr.msk.f32.mxu1 %vm4056_vm0, %v4055_v0  ;;  %3322 = vmatpush3.msra.mxu1 %v4282_v35 }
 0x137   :  { %3775 = vmatprep.subr.bf16.mxu1 %v4057_v5 }
 0x1e8   :  { %v454_v36 = vpop.f32.mrb[0].mxu1 }
 0x1e9   :  { %v3285_v37 = vpop.f32.mrb[1].mxu1  ;;  %v528_v38 = vmul.f32 0.00390625, %v454_v36  ;;  %v711_v36 = vld [vmem:[#allocation3] sm:$0x8] }
 0x1ea   :  { %v3986_v37 = vld [vmem:[%s4778_s2 + $0x20] sm:$0xff]  }
 0x1eb   :  { %v530_v40 = vmul.f32 %v528_v38, %v528_v38 }
 0x208   :  { %v524_v39 = vpop.f32.mrb[2].mxu1 }
 0x209   :  { %v529_v42 = vmul.f32 0.00390625, %v524_v39  ;;  %v3320_v43 = vpop.f32.mrb[3].mxu1 }
 0x20b   :  { %v531_v45 = vsub.f32 %v529_v42, %v530_v40  ;;  %v3987_v40 = vld [vmem:[%s4778_s2 + $0x28] sm:$0xff]  }
 0x20d   :  { %v532_v46 = vmax.f32 %v531_v45, 0.0 }
 0x20f   :  { %v533_v47 = vadd.f32 1e-05, %v532_v46 }
 0x211   :  { %4046 = vrsqrt.f32 %v533_v47  ;;  %v3988_v47 = vld [vmem:[%s4778_s2 + $0x30] sm:$0xff]  }
 0x21b   :  { %v4047_v49 = vpop.eup %4046 }
 0x21c   :  { %3324 = vmatmul.mubr.msk.f32.vlgmr.msra.gmra.mrb[4].mxu1 %vm536_vm11, %v4047_v49  ;;  %v535_v51 = vmul.f32 %v4047_v49, %v528_v38 }
 0x21d   :  { %3777 = vmatpush3.bf16.msra.mxu1 %v4147_v33  ;;  %3423 = vmatprep.mubr.msk.f32.mxu1 %vm4056_vm0, %v4055_v0 }
 0x21e   :  { %3329 = vmatmul.mubr.msk.f32.vlgmr.msra.gmra.mrb[4].mxu0 %vm536_vm11, %v535_v51  ;;  %3778 = vmatprep.subr.bf16.mxu1 %v4057_v5 }
 0x21f   :  { %3332 = vmatpush3.bf16.msra.mxu0 %v3971_v50  ;;  %3347 = vmatprep.mubr.msk.bf16.mxu0 %vm4056_vm0, %v4055_v0 }
 0x220   :  { %3333 = vmatprep.subr.bf16.mxu0 %v4055_v0 }
 0x221   :  { %3780 = vmatpush3.bf16.msra.mxu1 %v4160_v41 }
 0x222   :  { %3781 = vmatprep.subr.bf16.mxu1 %v4057_v5 }
 0x223   :  { %3334 = vmatpush3.bf16.msra.mxu0 %v3972_v52 }
 0x224   :  { %3335 = vmatprep.subr.bf16.mxu0 %v4055_v0 }
 0x225   :  { %3783 = vmatpush3.bf16.msra.mxu1 %v4171_v44 }
 0x226   :  { %3784 = vmatprep.subr.bf16.mxu1 %v4057_v5 }
 0x227   :  { %3336 = vmatpush3.bf16.msra.mxu0 %v3973_v53  ;;  %v3989_v53 = vld [vmem:[%s4778_s2 + $0x38] sm:$0xff]  }
 0x228   :  { %3337 = vmatprep.subr.bf16.mxu0 %v4055_v0 }
 0x229   :  { %3786 = vmatpush3.bf16.msra.mxu1 %v4179_v48 }
 0x22a   :  { %3787 = vmatprep.subr.bf16.mxu1 %v4057_v5 }
 0x22b   :  { %3338 = vmatpush3.bf16.msra.mxu0 %v3974_v54 }
 0x22c   :  { %3339 = vmatprep.subr.bf16.mxu0 %v4055_v0 }
 0x22d   :  { %3789 = vmatpush3.bf16.msra.mxu1 %v4215_v2 }
 0x22e   :  { %3790 = vmatprep.subr.bf16.mxu1 %v4057_v5 }
 0x22f   :  { %3340 = vmatpush3.bf16.msra.mxu0 %v3975_v55 }
 0x230   :  { %3341 = vmatprep.subr.bf16.mxu0 %v4055_v0 }
 0x231   :  { %3792 = vmatpush3.bf16.msra.mxu1 %v4225_v6 }
 0x232   :  { %3793 = vmatprep.subr.bf16.mxu1 %v4057_v5 }
 0x233   :  { %3342 = vmatpush3.bf16.msra.mxu0 %v3976_v56  ;;  %v3990_v56 = vld [vmem:[%s4778_s2 + $0x80] sm:$0xff]  }
 0x234   :  { %3343 = vmatprep.subr.bf16.mxu0 %v4055_v0 }
 0x235   :  { %3795 = vmatpush3.bf16.msra.mxu1 %v4235_v9 }
 0x236   :  { %3796 = vmatprep.subr.bf16.mxu1 %v4057_v5 }
 0x237   :  { %3344 = vmatpush3.bf16.msra.mxu0 %v3977_v60  ;;  %v3992_v60 = vld [vmem:[%s4778_s2 + $0x90] sm:$0xff]  }
 0x238   :  { %3345 = vmatprep.subr.bf16.mxu0 %v4055_v0 }
 0x239   :  { %3798 = vmatpush3.bf16.msra.mxu1 %v4245_v12 }
 0x23a   :  { %3799 = vmatprep.subr.bf16.mxu1 %v4057_v5 }
 0x23b   :  { %3346 = vmatpush3.bf16.msra.mxu0 %v3978_v63  ;;  %v3994_v63 = vld [vmem:[%s4778_s2 + $0xa0] sm:$0xff]  }
 0x23c   :  { %3351 = vmatprep.subr.bf16.mxu0 %v4055_v0 }
 0x2ef   :  { %v606_v8 = vpop.f32.mrb[4].mxu1 }
 0x2f0   :  { %v686_v10 = vrot.slane %v606_v8, %v4356_v7  ;;  %v3325_v11 = vpop.f32.mrb[5].mxu1 }
 0x2f1   :  { %v679_v14 = vpop.f32.mrb[4].mxu0 }
 0x2f2   :  { %v687_v16 = vmul.f32 %v686_v10, %v4249_v13  ;;  %v688_v17 = vmul.f32 %v686_v10, %v4251_v15  ;;  %v692_v18 = vrot.slane %v679_v14, %v4356_v7  ;;  %v3330_v20 = vpop.f32.mrb[5].mxu0  ;;  %v3982_v13 = vld [vmem:[%s4778_s2] sm:$0xff]   ;;  %v3996_v10 = vld [vmem:[%s4778_s2 + $0xb0] sm:$0xff]   ;;  %v989_v14 = vshll.u32 %v3999_v4, 16 }
 0x2f3   :  { %v4002_v4 = vld [vmem:[%s4774_s1 + $0x30] sm:$0xff]  }
 0x2f4   :  { %v693_v21 = vsub.f32 %v687_v16, %v692_v18  ;;  %v694_v22 = vsub.f32 %v688_v17, %v692_v18  ;;  %v3997_v16 = vld [vmem:[%s4778_s2 + $0xb8] sm:$0xff]   ;;  %v991_v20 = vrot.slane %v989_v14, 1  ;;  %v1429_v14 = vld [vmem:[#allocation2 + $0x10] sm:$0x8] }
 0x2f6   :  { %vm695_vm1 = vcmp.ge.f32.partialorder %v693_v21, 0.0  ;;  %vm696_vm2 = vcmp.ge.f32.partialorder %v694_v22, 0.0  ;;  %v697_v23 = vmul.f32 0.2, %v693_v21  ;;  %v698_v24 = vmul.f32 0.2, %v694_v22 }
 0x2f8   :  { %v699_v25 = vsel %vm695_vm1, %v693_v21, %v697_v23  ;;  %v700_v26 = vsel %vm696_vm2, %v694_v22, %v698_v24 }
 0x2f9   :  { %v2973_v27 = vpack.c.bf16 %v699_v25, %v699_v25  ;;  %v2974_v28 = vpack.c.bf16 %v700_v26, %v700_v26 }
 0x2fb   :  { %709 = vst [vmem:[#allocation3 + $0x4] sm:$0xf] %v2973_v27  ;;  %710 = vst [vmem:[#allocation3 + $0x8] sm:$0xf] %v2974_v28 }
 0x302   :  { %v712_v15 = vld [vmem:[#allocation3 + $0x4] sm:$0xf]  ;;  %v713_v29 = vld [vmem:[#allocation3 + $0x8] sm:$0xf] }
 0x303   :  { %v2815_v30 = vcombine.low %v712_v15, %v713_v29  ;;  %v2824_v38 = vcombine.low %v711_v36, %v712_v15  ;;  %v2825_v39 = vcombine.low %v713_v29, %v713_v29  ;;  %v3998_v1 = vld [vmem:[#allocation3 + $0x4] sm:$0xff]  }
 0x304   :  { %v984_v8 = vshll.u32 %v3998_v1, 16  ;;  %v982_v17 = vshrl.u32 %v3998_v1, 16 }
 0x305   :  { %3348 = vmatmul.mubr.bf16.vlgmr.msra.gmra.mrb[8].mxu0 %v2815_v30  ;;  %v847_v42 = vshrl.u32 %v2824_v38, 16  ;;  %v850_v43 = vshll.u32 %v2824_v38, 16  ;;  %v855_v45 = vshrl.u32 %v2825_v39, 16  ;;  %v858_v46 = vshll.u32 %v2825_v39, 16 }
 0x306   :  { %3352 = vmatpush3.bf16.msra.mxu0 %v3982_v13  ;;  %3367 = vmatprep.mubr.msk.bf16.mxu0 %vm4056_vm0, %v4055_v0  ;;  %v986_v11 = vrot.slane %v984_v8, 1  ;;  %v4003_v8 = vld [vmem:[%s4774_s1 + $0x38] sm:$0xff]  }
 0x307   :  { %3353 = vmatprep.subr.bf16.mxu0 %v4055_v0  ;;  %v849_v49 = vrot.slane %v847_v42, 3  ;;  %v852_v50 = vrot.slane %v850_v43, 4  ;;  %v857_v51 = vrot.slane %v855_v45, 3  ;;  %v860_v52 = vrot.slane %v858_v46, 4  ;;  %v2862_v43 = vld [vmem:[%s4775_s0 + $0x10] sm:$0xff]  ;;  %v2863_v45 = vld [vmem:[%s4775_s0 + $0x18] sm:$0xff] }
 0x308   :  { %v987_v18 = vor.u32 %v986_v11, %v982_v17  ;;  %v2975_v46 = vpack.c.bf16 %v2862_v43, %v2862_v43  ;;  %v4013_v43 = vld [vmem:[%s4774_s1 + $0x50] sm:$0xff]  }
 0x309   :  { %v853_v54 = vor.u32 %v852_v50, %v849_v49  ;;  %v861_v55 = vor.u32 %v860_v52, %v857_v51  ;;  %v36_v49 = vld [vmem:[#allocation2 + $0x1c] sm:$0x1] }
 0x30a   :  { %3354 = vmatpush3.bf16.msra.mxu0 %v3983_v31  ;;  %v992_v21 = vsel %vm289_vm10, %v987_v18, %v991_v20  ;;  %1427 = vst.msk [vmem:[#allocation2 + $0x14] sm:$0xf] %vm82_vm4, %v2975_v46  ;;  %v37_v50 = vsel %vm4123_vm8, 0, %v36_v49  ;;  %v4007_v20 = vld [vmem:[%s4774_s1] sm:$0xff]   ;;  %v4014_v49 = vld [vmem:[%s4774_s1 + $0x58] sm:$0xff]  }
 0x30b   :  { %3355 = vmatprep.subr.bf16.mxu0 %v4055_v0  ;;  %v862_v58 = vsel %vm183_vm9, %v853_v54, %v861_v55  ;;  %38 = vst [vmem:[#allocation2 + $0x1c] sm:$0x1] %v37_v50 }
 0x30e   :  { %3356 = vmatpush3.bf16.msra.mxu0 %v3984_v32 }
 0x30f   :  { %3357 = vmatprep.subr.bf16.mxu0 %v4055_v0 }
 0x312   :  { %3358 = vmatpush3.bf16.msra.mxu0 %v3985_v34 }
 0x313   :  { %3359 = vmatprep.subr.bf16.mxu0 %v4055_v0 }
 0x316   :  { %3360 = vmatpush3.bf16.msra.mxu0 %v3986_v37 }
 0x317   :  { %3361 = vmatprep.subr.bf16.mxu0 %v4055_v0 }
 0x31a   :  { %3362 = vmatpush3.bf16.msra.mxu0 %v3987_v40 }
 0x31b   :  { %3363 = vmatprep.subr.bf16.mxu0 %v4055_v0 }
 0x31e   :  { %3364 = vmatpush3.bf16.msra.mxu0 %v3988_v47  ;;  %v2976_v47 = vpack.c.bf16 %v2863_v45, %v2863_v45 }
 0x31f   :  { %3365 = vmatprep.subr.bf16.mxu0 %v4055_v0 }
 0x320   :  { %1428 = vst.msk [vmem:[#allocation2 + $0x18] sm:$0xf] %vm82_vm4, %v2976_v47 }
 0x322   :  { %3366 = vmatpush3.bf16.msra.mxu0 %v3989_v53 }
 0x323   :  { %3371 = vmatprep.subr.bf16.mxu0 %v4055_v0 }
 0x325   :  { %3368 = vmatmul.mubr.bf16.vlgmr.msra.gmra.mrb[8].mxu0 %v862_v58 }
 0x326   :  { %3372 = vmatpush3.bf16.msra.mxu0 %v3990_v56  ;;  %3387 = vmatprep.mubr.msk.bf16.mxu0 %vm4056_vm0, %v4055_v0 }
 0x327   :  { %3373 = vmatprep.subr.bf16.mxu0 %v4055_v0  ;;  %v1431_v11 = vld [vmem:[#allocation2 + $0x18] sm:$0xf] }
 0x328   :  { %v2881_v18 = vcombine.low %v1431_v11, %v1431_v11 }
 0x32a   :  { %3374 = vmatpush3.bf16.msra.mxu0 %v3991_v59 }
 0x32b   :  { %3375 = vmatprep.subr.bf16.mxu0 %v4055_v0 }
 0x32e   :  { %3376 = vmatpush3.bf16.msra.mxu0 %v3992_v60 }
 0x32f   :  { %3377 = vmatprep.subr.bf16.mxu0 %v4055_v0 }
 0x332   :  { %3378 = vmatpush3.bf16.msra.mxu0 %v3993_v62 }
 0x333   :  { %3379 = vmatprep.subr.bf16.mxu0 %v4055_v0 }
 0x336   :  { %3380 = vmatpush3.bf16.msra.mxu0 %v3994_v63 }
 0x337   :  { %3381 = vmatprep.subr.bf16.mxu0 %v4055_v0 }
 0x33a   :  { %3382 = vmatpush3.bf16.msra.mxu0 %v3995_v3  ;;  %v4001_v3 = vld [vmem:[%s4774_s1 + $0x28] sm:$0xff]  }
 0x33b   :  { %3383 = vmatprep.subr.bf16.mxu0 %v4055_v0 }
 0x33e   :  { %3384 = vmatpush3.bf16.msra.mxu0 %v3996_v10  ;;  %v1430_v10 = vld [vmem:[#allocation2 + $0x14] sm:$0xf] }
 0x33f   :  { %3385 = vmatprep.subr.bf16.mxu0 %v4055_v0  ;;  %v2880_v17 = vcombine.low %v1429_v14, %v1430_v10 }
 0x342   :  { %3386 = vmatpush3.bf16.msra.mxu0 %v3997_v16  ;;  %v2874_v16 = vcombine.low %v1430_v10, %v1431_v11 }
 0x343   :  { %3823 = vmatprep.subr.bf16.mxu0 %v4057_v5 }
 0x345   :  { %3388 = vmatmul.mubr.bf16.vlgmr.msra.gmra.mrb[8].mxu0 %v992_v21  ;;  %v4008_v21 = vld [vmem:[%s4774_s1 + $0x8] sm:$0xff]  }
 0x346   :  { %3825 = vmatpush3.bf16.msra.mxu0 %v4147_v33  ;;  %3539 = vmatprep.mubr.msk.f32.mxu0 %vm4056_vm0, %v4055_v0 }
 0x347   :  { %3826 = vmatprep.subr.bf16.mxu0 %v4057_v5 }
 0x34a   :  { %3828 = vmatpush3.bf16.msra.mxu0 %v4160_v41 }
 0x34b   :  { %3829 = vmatprep.subr.bf16.mxu0 %v4057_v5 }
 0x34e   :  { %3831 = vmatpush3.bf16.msra.mxu0 %v4171_v44 }
 0x34f   :  { %3832 = vmatprep.subr.bf16.mxu0 %v4057_v5 }
 0x352   :  { %3834 = vmatpush3.bf16.msra.mxu0 %v4179_v48 }
 0x353   :  { %3835 = vmatprep.subr.bf16.mxu0 %v4057_v5 }
 0x356   :  { %3837 = vmatpush3.bf16.msra.mxu0 %v4215_v2 }
 0x357   :  { %3838 = vmatprep.subr.bf16.mxu0 %v4057_v5 }
 0x35a   :  { %3840 = vmatpush3.bf16.msra.mxu0 %v4225_v6 }
 0x35b   :  { %3841 = vmatprep.subr.bf16.mxu0 %v4057_v5 }
 0x35e   :  { %3843 = vmatpush3.bf16.msra.mxu0 %v4235_v9 }
 0x35f   :  { %3844 = vmatprep.subr.bf16.mxu0 %v4057_v5 }
 0x362   :  { %3846 = vmatpush3.bf16.msra.mxu0 %v4245_v12 }
 0x363   :  { %3577 = vmatprep.subr.mxu0 %v4055_v0 }
 0x418   :  { %v4450_v22 = vpop.f32.mrb[8].mxu0 }
 0x419   :  { %v3389_v23 = vpop.f32.mrb[9].mxu0  ;;  %v1092_v25 = vmul.f32 %v4450_v22, %v4450_v22 }
 0x41a   :  { %v4452_v24 = vpop.f32.mrb[10].mxu0  ;;  %v1526_v23 = vshrl.u32 %v2880_v17, 16 }
 0x41b   :  { %v1085_v26 = vadd.f32 %v4452_v24, %v4450_v22  ;;  %v1093_v27 = vmul.f32 %v4452_v24, %v4452_v24  ;;  %v3390_v28 = vpop.f32.mrb[11].mxu0 }
 0x41c   :  { %v4009_v28 = vld [vmem:[%s4774_s1 + $0x10] sm:$0xff]  }
 0x41d   :  { %v1086_v13 = vrot.slane %v1085_v26, 4  ;;  %v1094_v15 = vadd.f32 %v1093_v27, %v1092_v25  ;;  %v1529_v25 = vshll.u32 %v2880_v17, 16  ;;  %v1537_v27 = vshll.u32 %v2881_v18, 16 }
 0x41f   :  { %v1087_v29 = vadd.f32 %v1086_v13, %v1085_v26  ;;  %v1095_v36 = vrot.slane %v1094_v15, 4  ;;  %v1534_v26 = vshrl.u32 %v2881_v18, 16  ;;  %v1528_v13 = vrot.slane %v1526_v23, 3 }
 0x421   :  { %v1088_v30 = vrot.slane %v1087_v29, 2  ;;  %v1096_v37 = vadd.f32 %v1095_v36, %v1094_v15  ;;  %v1531_v15 = vrot.slane %v1529_v25, 4 }
 0x423   :  { %v1089_v31 = vadd.f32 %v1088_v30, %v1087_v29  ;;  %v1097_v38 = vrot.slane %v1096_v37, 2  ;;  %v1536_v29 = vrot.slane %v1534_v26, 3  ;;  %v1539_v30 = vrot.slane %v1537_v27, 4 }
 0x425   :  { %v1090_v32 = vrot.slane %v1089_v31, 1  ;;  %v1098_v39 = vadd.f32 %v1097_v38, %v1096_v37  ;;  %v4011_v37 = vld [vmem:[%s4774_s1 + $0x40] sm:$0xff]   ;;  %v4015_v38 = vld [vmem:[#allocation2 + $0x14] sm:$0xff]  }
 0x426   :  { %v1630_v45 = vshrl.u32 %v4015_v38, 16 }
 0x427   :  { %v1091_v34 = vadd.f32 %v1090_v32, %v1089_v31  ;;  %v1099_v40 = vrot.slane %v1098_v39, 1  ;;  %v4010_v31 = vld [vmem:[%s4774_s1 + $0x18] sm:$0xff]   ;;  %v1532_v32 = vor.u32 %v1531_v15, %v1528_v13 }
 0x429   :  { %3424 = vmatmul.mubr.f32.vlgmr.msra.gmra.mrb[6].mxu1 %v1091_v34  ;;  %v1100_v42 = vadd.f32 %v1099_v40, %v1098_v39  ;;  %v1540_v34 = vor.u32 %v1539_v30, %v1536_v29  ;;  %v4012_v39 = vld [vmem:[%s4774_s1 + $0x48] sm:$0xff]   ;;  %v4016_v40 = vld [vmem:[#allocation2 + $0x1c] ss:$0 sps:$4 sm:$0x11]  }
 0x42a   :  { %3801 = vmatpush3.bf16.msra.mxu1 %v4147_v33  ;;  %3458 = vmatprep.mubr.msk.f32.mxu1 %vm4056_vm0, %v4055_v0  ;;  %v1637_v47 = vshll.u32 %v4016_v40, 16 }
 0x42b   :  { %3802 = vmatprep.subr.bf16.mxu1 %v4057_v5  ;;  %v1541_v36 = vsel %vm183_vm9, %v1532_v32, %v1540_v34 }
 0x42e   :  { %3804 = vmatpush3.bf16.msra.mxu1 %v4160_v41 }
 0x42f   :  { %3805 = vmatprep.subr.bf16.mxu1 %v4057_v5 }
 0x432   :  { %3807 = vmatpush3.bf16.msra.mxu1 %v4171_v44 }
 0x433   :  { %3808 = vmatprep.subr.bf16.mxu1 %v4057_v5 }
 0x436   :  { %3810 = vmatpush3.bf16.msra.mxu1 %v4179_v48 }
 0x437   :  { %3811 = vmatprep.subr.bf16.mxu1 %v4057_v5 }
 0x43a   :  { %3813 = vmatpush3.bf16.msra.mxu1 %v4215_v2 }
 0x43b   :  { %3814 = vmatprep.subr.bf16.mxu1 %v4057_v5 }
 0x43e   :  { %3816 = vmatpush3.bf16.msra.mxu1 %v4225_v6 }
 0x43f   :  { %3817 = vmatprep.subr.bf16.mxu1 %v4057_v5 }
 0x442   :  { %3819 = vmatpush3.bf16.msra.mxu1 %v4235_v9 }
 0x443   :  { %3820 = vmatprep.subr.bf16.mxu1 %v4057_v5 }
 0x446   :  { %3822 = vmatpush3.bf16.msra.mxu1 %v4245_v12 }
 0x447   :  { %3461 = vmatprep.subr.mxu1 %v4055_v0 }
 0x449   :  { %3459 = vmatmul.mubr.f32.vlgmr.msra.gmra.mrb[8].mxu1 %v1100_v42  ;;  %v1632_v42 = vshll.u32 %v4015_v38, 16 }
 0x44a   :  { %3462 = vmatpush3.msra.mxu1 %v4282_v35  ;;  %3463 = vmatprep.mubr.msk.f32.mxu1 %vm4056_vm0, %v4055_v0 }
 0x44b   :  { %3466 = vmatprep.subr.mxu1 %v4055_v0  ;;  %v1634_v46 = vrot.slane %v1632_v42, 1 }
 0x44d   :  { %v1635_v50 = vor.u32 %v1634_v46, %v1630_v45 }
 0x4fc   :  { %v1167_v51 = vpop.f32.mrb[6].mxu1 }
 0x4fd   :  { %v3425_v52 = vpop.f32.mrb[7].mxu1  ;;  %v1241_v53 = vmul.f32 0.00390625, %v1167_v51  ;;  %v1639_v51 = vrot.slane %v1637_v47, 1  ;;  %v4621_v47 = vld [vmem:[%s4777_s4] sm:$0xff] }
 0x4ff   :  { %v1243_v55 = vmul.f32 %v1241_v53, %v1241_v53  ;;  %v1640_v52 = vsel %vm289_vm10, %v1635_v50, %v1639_v51  ;;  %v4018_v50 = vld [vmem:[%s4778_s2 + $0x48] sm:$0xff]   ;;  %v4019_v51 = vld [vmem:[%s4778_s2 + $0x50] sm:$0xff]  }
 0x51c   :  { %v1237_v54 = vpop.f32.mrb[8].mxu1 }
 0x51d   :  { %v1242_v56 = vmul.f32 0.00390625, %v1237_v54  ;;  %v3460_v58 = vpop.f32.mrb[9].mxu1 }
 0x51f   :  { %v1244_v59 = vsub.f32 %v1242_v56, %v1243_v55 }
 0x521   :  { %v1245_v60 = vmax.f32 %v1244_v59, 0.0 }
 0x523   :  { %v1246_v62 = vadd.f32 1e-05, %v1245_v60 }
 0x525   :  { %4048 = vrsqrt.f32 %v1246_v62 }
 0x52f   :  { %v4049_v63 = vpop.eup %4048 }
 0x530   :  { %3464 = vmatmul.mubr.msk.f32.vlgmr.msra.gmra.mrb[10].mxu1 %vm536_vm11, %v4049_v63  ;;  %v1248_v1 = vmul.f32 %v4049_v63, %v1241_v53 }
 0x531   :  { %3467 = vmatpush3.msra.mxu1 %v4282_v35  ;;  %3468 = vmatprep.mubr.msk.f32.mxu1 %vm4056_vm0, %v4055_v0 }
 0x532   :  { %3471 = vmatprep.subr.bf16.mxu1 %v4055_v0 }
 0x534   :  { %3469 = vmatmul.mubr.msk.f32.vlgmr.msra.gmra.mrb[12].mxu1 %vm536_vm11, %v1248_v1 }
 0x535   :  { %3472 = vmatpush3.bf16.msra.mxu1 %v4000_v19  ;;  %3479 = vmatprep.mubr.msk.bf16.mxu1 %vm4056_vm0, %v4055_v0 }
 0x536   :  { %3473 = vmatprep.subr.bf16.mxu1 %v4055_v0 }
 0x539   :  { %3474 = vmatpush3.bf16.msra.mxu1 %v4001_v3 }
 0x53a   :  { %3475 = vmatprep.subr.bf16.mxu1 %v4055_v0 }
 0x53d   :  { %3476 = vmatpush3.bf16.msra.mxu1 %v4002_v4 }
 0x53e   :  { %3477 = vmatprep.subr.bf16.mxu1 %v4055_v0 }
 0x541   :  { %3478 = vmatpush3.bf16.msra.mxu1 %v4003_v8 }
 0x542   :  { %3483 = vmatprep.subr.bf16.mxu1 %v4055_v0 }
 0x544   :  { %3480 = vmatmul.mubr.msk.bf16.vlgmr.msra.gmra.mrb[16].mxu1 %vm134_vm7, %v2874_v16 }
 0x545   :  { %3484 = vmatpush3.bf16.msra.mxu1 %v4007_v20  ;;  %3491 = vmatprep.mubr.msk.bf16.mxu1 %vm4056_vm0, %v4055_v0 }
 0x546   :  { %3485 = vmatprep.subr.bf16.mxu1 %v4055_v0 }
 0x549   :  { %3486 = vmatpush3.bf16.msra.mxu1 %v4008_v21 }
 0x54a   :  { %3487 = vmatprep.subr.bf16.mxu1 %v4055_v0 }
 0x54d   :  { %3488 = vmatpush3.bf16.msra.mxu1 %v4009_v28 }
 0x54e   :  { %3489 = vmatprep.subr.bf16.mxu1 %v4055_v0 }
 0x551   :  { %3490 = vmatpush3.bf16.msra.mxu1 %v4010_v31 }
 0x552   :  { %3495 = vmatprep.subr.bf16.mxu1 %v4055_v0 }
 0x554   :  { %3492 = vmatmul.mubr.msk.bf16.vlgmr.msra.gmra.mrb[16].mxu1 %vm134_vm7, %v1541_v36 }
 0x555   :  { %3496 = vmatpush3.bf16.msra.mxu1 %v4011_v37  ;;  %3503 = vmatprep.mubr.msk.bf16.mxu1 %vm4056_vm0, %v4055_v0 }
 0x556   :  { %3497 = vmatprep.subr.bf16.mxu1 %v4055_v0 }
 0x559   :  { %3498 = vmatpush3.bf16.msra.mxu1 %v4012_v39 }
 0x55a   :  { %3499 = vmatprep.subr.bf16.mxu1 %v4055_v0 }
 0x55d   :  { %3500 = vmatpush3.bf16.msra.mxu1 %v4013_v43 }
 0x55e   :  { %3501 = vmatprep.subr.bf16.mxu1 %v4055_v0 }
 0x561   :  { %3502 = vmatpush3.bf16.msra.mxu1 %v4014_v49  ;;  %v4017_v49 = vld [vmem:[%s4778_s2 + $0x40] sm:$0xff]  }
 0x562   :  { %3847 = vmatprep.subr.bf16.mxu1 %v4057_v5 }
 0x564   :  { %3504 = vmatmul.mubr.msk.bf16.vlgmr.msra.gmra.mrb[16].mxu1 %vm134_vm7, %v1640_v52  ;;  %v4020_v52 = vld [vmem:[%s4778_s2 + $0x58] sm:$0xff]  }
 0x565   :  { %3849 = vmatpush3.bf16.msra.mxu1 %v4147_v33  ;;  %3574 = vmatprep.mubr.msk.f32.mxu1 %vm4056_vm0, %v4055_v0 }
 0x566   :  { %3850 = vmatprep.subr.bf16.mxu1 %v4057_v5 }
 0x569   :  { %3852 = vmatpush3.bf16.msra.mxu1 %v4160_v41 }
 0x56a   :  { %3853 = vmatprep.subr.bf16.mxu1 %v4057_v5 }
 0x56d   :  { %3855 = vmatpush3.bf16.msra.mxu1 %v4171_v44 }
 0x56e   :  { %3856 = vmatprep.subr.bf16.mxu1 %v4057_v5 }
 0x571   :  { %3858 = vmatpush3.bf16.msra.mxu1 %v4179_v48 }
 0x572   :  { %3859 = vmatprep.subr.bf16.mxu1 %v4057_v5 }
 0x575   :  { %3861 = vmatpush3.bf16.msra.mxu1 %v4215_v2 }
 0x576   :  { %3862 = vmatprep.subr.bf16.mxu1 %v4057_v5 }
 0x579   :  { %3864 = vmatpush3.bf16.msra.mxu1 %v4225_v6 }
 0x57a   :  { %3865 = vmatprep.subr.bf16.mxu1 %v4057_v5 }
 0x57d   :  { %3867 = vmatpush3.bf16.msra.mxu1 %v4235_v9 }
 0x57e   :  { %3868 = vmatprep.subr.bf16.mxu1 %v4057_v5 }
 0x581   :  { %3870 = vmatpush3.bf16.msra.mxu1 %v4245_v12 }
 0x582   :  { %3871 = vmatprep.subr.bf16.mxu1 %v4057_v5 }
 0x603   :  { %v1318_v53 = vpop.f32.mrb[10].mxu1 }
 0x604   :  { %v1398_v54 = vrot.slane %v1318_v53, %v4356_v7  ;;  %v3465_v55 = vpop.f32.mrb[11].mxu1  ;;  %v4021_v53 = vld [vmem:[%s4778_s2 + $0x60] sm:$0xff]  }
 0x605   :  { %v44_v55 = vld [vmem:[#allocation3 + $0x10] sm:$0x8] }
 0x606   :  { %v1399_v56 = vmul.f32 %v1398_v54, %v4450_v22  ;;  %v1400_v58 = vmul.f32 %v1398_v54, %v4452_v24  ;;  %v4022_v54 = vld [vmem:[%s4778_s2 + $0x68] sm:$0xff]  }
 0x607   :  { %v1391_v59 = vpop.f32.mrb[12].mxu1 }
 0x608   :  { %v1404_v60 = vrot.slane %v1391_v59, %v4356_v7  ;;  %v3470_v62 = vpop.f32.mrb[13].mxu1  ;;  %v52_v59 = vld [vmem:[#allocation3 + $0x1c] sm:$0x1] }
 0x609   :  { %v53_v62 = vsel %vm4345_vm15, 0, %v52_v59 }
 0x60a   :  { %v1405_v63 = vsub.f32 %v1399_v56, %v1404_v60  ;;  %v1406_v1 = vsub.f32 %v1400_v58, %v1404_v60  ;;  %v45_v56 = vsel %vm4334_vm13, 0, %v44_v55  ;;  %v4023_v58 = vld [vmem:[%s4778_s2 + $0x70] sm:$0xff]   ;;  %v4024_v60 = vld [vmem:[%s4778_s2 + $0x78] sm:$0xff]   ;;  %54 = vst [vmem:[#allocation3 + $0x1c] sm:$0x1] %v53_v62 }
 0x60b   :  { %46 = vst [vmem:[#allocation3 + $0x10] sm:$0x8] %v45_v56  ;;  %v4041_v56 = vld [vmem:[%s4778_s2 + $0xa8] sm:$0xff]  }
 0x60c   :  { %vm1407_vm3 = vcmp.ge.f32.partialorder %v1405_v63, 0.0  ;;  %vm1408_vm4 = vcmp.ge.f32.partialorder %v1406_v1, 0.0  ;;  %v1409_v19 = vmul.f32 0.2, %v1405_v63  ;;  %v1410_v3 = vmul.f32 0.2, %v1406_v1 }
 0x60e   :  { %v1411_v4 = vsel %vm1407_vm3, %v1405_v63, %v1409_v19  ;;  %v1412_v8 = vsel %vm1408_vm4, %v1406_v1, %v1410_v3 }
 0x60f   :  { %1413 = vst [vmem:[%s4779_s5] sm:$0xff] %v1411_v4  ;;  %1414 = vst [vmem:[%s4779_s5 + $0x8] sm:$0xff] %v1412_v8 }
 0x637   :  { %v4585_v22 = vpop.f32.mrb[16].mxu1 }
 0x638   :  { %v3505_v24 = vpop.f32.mrb[17].mxu1  ;;  %v1718_v11 = vmul.f32 %v4585_v22, %v4585_v22 }
 0x639   :  { %v4587_v10 = vpop.f32.mrb[18].mxu1 }
 0x63a   :  { %v1711_v14 = vadd.f32 %v4587_v10, %v4585_v22  ;;  %v1719_v16 = vmul.f32 %v4587_v10, %v4587_v10  ;;  %v3506_v17 = vpop.f32.mrb[19].mxu1 }
 0x63c   :  { %v1712_v18 = vrot.slane %v1711_v14, 4  ;;  %v1720_v20 = vadd.f32 %v1719_v16, %v1718_v11 }
 0x63e   :  { %v1713_v21 = vadd.f32 %v1712_v18, %v1711_v14  ;;  %v1721_v23 = vrot.slane %v1720_v20, 4 }
 0x640   :  { %v1714_v25 = vrot.slane %v1713_v21, 2  ;;  %v1722_v26 = vadd.f32 %v1721_v23, %v1720_v20 }
 0x642   :  { %v1715_v27 = vadd.f32 %v1714_v25, %v1713_v21  ;;  %v1723_v28 = vrot.slane %v1722_v26, 2 }
 0x644   :  { %v1716_v13 = vrot.slane %v1715_v27, 1  ;;  %v1724_v15 = vadd.f32 %v1723_v28, %v1722_v26  ;;  %v4029_v26 = vld [vmem:[%s4778_s2 + $0x8] sm:$0xff]   ;;  %v4031_v28 = vld [vmem:[%s4778_s2 + $0x18] sm:$0xff]  }
 0x646   :  { %v1717_v29 = vadd.f32 %v1716_v13, %v1715_v27  ;;  %v1725_v30 = vrot.slane %v1724_v15, 1  ;;  %v4030_v27 = vld [vmem:[%s4778_s2 + $0x10] sm:$0xff]  }
 0x647   :  { %v2050_v13 = vld [vmem:[#allocation3 + $0x10] sm:$0x8] }
 0x648   :  { %3540 = vmatmul.mubr.f32.vlgmr.msra.gmra.mrb[6].mxu0 %v1717_v29  ;;  %v1726_v31 = vadd.f32 %v1725_v30, %v1724_v15  ;;  %v4032_v15 = vld [vmem:[%s4778_s2 + $0x20] sm:$0xff]  }
 0x649   :  { %3578 = vmatpush3.msra.mxu0 %v4282_v35  ;;  %3579 = vmatprep.mubr.msk.f32.mxu0 %vm4056_vm0, %v4055_v0 }
 0x64a   :  { %3575 = vmatmul.mubr.f32.vlgmr.msra.gmra.mrb[14].mxu1 %v1726_v31  ;;  %3582 = vmatprep.subr.mxu0 %v4055_v0  ;;  %v4033_v31 = vld [vmem:[%s4778_s2 + $0x28] sm:$0xff]  }
 0x64b   :  { %3873 = vmatpush3.bf16.msra.mxu1 %v4147_v33  ;;  %3679 = vmatprep.mubr.msk.f32.mxu1 %vm4056_vm0, %v4055_v0 }
 0x64c   :  { %3874 = vmatprep.subr.bf16.mxu1 %v4057_v5 }
 0x64f   :  { %3876 = vmatpush3.bf16.msra.mxu1 %v4160_v41 }
 0x650   :  { %3877 = vmatprep.subr.bf16.mxu1 %v4057_v5 }
 0x653   :  { %3879 = vmatpush3.bf16.msra.mxu1 %v4171_v44 }
 0x654   :  { %3880 = vmatprep.subr.bf16.mxu1 %v4057_v5 }
 0x657   :  { %3882 = vmatpush3.bf16.msra.mxu1 %v4179_v48 }
 0x658   :  { %3883 = vmatprep.subr.bf16.mxu1 %v4057_v5 }
 0x65b   :  { %3885 = vmatpush3.bf16.msra.mxu1 %v4215_v2 }
 0x65c   :  { %3886 = vmatprep.subr.bf16.mxu1 %v4057_v5 }
 0x65f   :  { %3888 = vmatpush3.bf16.msra.mxu1 %v4225_v6 }
 0x660   :  { %3889 = vmatprep.subr.bf16.mxu1 %v4057_v5 }
 0x663   :  { %3891 = vmatpush3.bf16.msra.mxu1 %v4235_v9 }
 0x664   :  { %3892 = vmatprep.subr.bf16.mxu1 %v4057_v5 }
 0x667   :  { %3894 = vmatpush3.bf16.msra.mxu1 %v4245_v12 }
 0x668   :  { %3895 = vmatprep.subr.bf16.mxu1 %v4057_v5 }
 0x71b   :  { %v1793_v35 = vpop.f32.mrb[6].mxu0 }
 0x71c   :  { %v1867_v32 = vmul.f32 0.00390625, %v1793_v35  ;;  %v3541_v34 = vpop.f32.mrb[7].mxu0 }
 0x71d   :  { %v1863_v36 = vpop.f32.mrb[14].mxu1 }
 0x71e   :  { %v1869_v37 = vmul.f32 %v1867_v32, %v1867_v32  ;;  %v1868_v38 = vmul.f32 0.00390625, %v1863_v36  ;;  %v3576_v39 = vpop.f32.mrb[15].mxu1 }
 0x720   :  { %v1870_v40 = vsub.f32 %v1868_v38, %v1869_v37  ;;  %v4034_v37 = vld [vmem:[%s4778_s2 + $0x30] sm:$0xff]  }
 0x722   :  { %v1871_v42 = vmax.f32 %v1870_v40, 0.0 }
 0x724   :  { %v1872_v43 = vadd.f32 1e-05, %v1871_v42 }
 0x726   :  { %4050 = vrsqrt.f32 %v1872_v43  ;;  %v4035_v43 = vld [vmem:[%s4778_s2 + $0x38] sm:$0xff]  }
 0x730   :  { %v4051_v45 = vpop.eup %4050 }
 0x731   :  { %3580 = vmatmul.mubr.msk.f32.vlgmr.msra.gmra.mrb[12].mxu0 %vm536_vm11, %v4051_v45  ;;  %v1874_v46 = vmul.f32 %v4051_v45, %v1867_v32 }
 0x732   :  { %3583 = vmatpush3.msra.mxu0 %v4621_v47  ;;  %3584 = vmatprep.mubr.msk.f32.mxu0 %vm4056_vm0, %v4055_v0 }
 0x733   :  { %3587 = vmatprep.subr.bf16.mxu0 %v4055_v0 }
 0x735   :  { %3585 = vmatmul.mubr.msk.f32.vlgmr.msra.gmra.mrb[14].mxu0 %vm536_vm11, %v1874_v46 }
 0x736   :  { %3588 = vmatpush3.bf16.msra.mxu0 %v4017_v49  ;;  %3603 = vmatprep.mubr.msk.bf16.mxu0 %vm4056_vm0, %v4055_v0  ;;  %v4036_v49 = vld [vmem:[%s4778_s2 + $0x80] sm:$0xff]  }
 0x737   :  { %3589 = vmatprep.subr.bf16.mxu0 %v4055_v0 }
 0x73a   :  { %3590 = vmatpush3.bf16.msra.mxu0 %v4018_v50 }
 0x73b   :  { %3591 = vmatprep.subr.bf16.mxu0 %v4055_v0 }
 0x73e   :  { %3592 = vmatpush3.bf16.msra.mxu0 %v4019_v51  ;;  %v4037_v51 = vld [vmem:[%s4778_s2 + $0x88] sm:$0xff]  }
 0x73f   :  { %3593 = vmatprep.subr.bf16.mxu0 %v4055_v0 }
 0x742   :  { %3594 = vmatpush3.bf16.msra.mxu0 %v4020_v52  ;;  %v4038_v52 = vld [vmem:[%s4778_s2 + $0x90] sm:$0xff]  }
 0x743   :  { %3595 = vmatprep.subr.bf16.mxu0 %v4055_v0 }
 0x746   :  { %3596 = vmatpush3.bf16.msra.mxu0 %v4021_v53  ;;  %v4039_v53 = vld [vmem:[%s4778_s2 + $0x98] sm:$0xff]  }
 0x747   :  { %3597 = vmatprep.subr.bf16.mxu0 %v4055_v0 }
 0x74a   :  { %3598 = vmatpush3.bf16.msra.mxu0 %v4022_v54  ;;  %v4040_v54 = vld [vmem:[%s4778_s2 + $0xa0] sm:$0xff]  }
 0x74b   :  { %3599 = vmatprep.subr.bf16.mxu0 %v4055_v0 }
 0x74e   :  { %3600 = vmatpush3.bf16.msra.mxu0 %v4023_v58  ;;  %v4045_v58 = vld [vmem:[#allocation3 + $0x1c] ss:$0 sps:$4 sm:$0x11]  }
 0x74f   :  { %3601 = vmatprep.subr.bf16.mxu0 %v4055_v0 }
 0x752   :  { %3602 = vmatpush3.bf16.msra.mxu0 %v4024_v60  ;;  %v4042_v60 = vld [vmem:[%s4778_s2 + $0xb0] sm:$0xff]  }
 0x753   :  { %3607 = vmatprep.subr.bf16.mxu0 %v4055_v0 }
 0x804   :  { %v1944_v57 = vpop.f32.mrb[12].mxu0 }
 0x805   :  { %v2024_v63 = vrot.slane %v1944_v57, %v4356_v7  ;;  %v3581_v1 = vpop.f32.mrb[13].mxu0  ;;  %v2326_v57 = vshll.u32 %v4045_v58, 16 }
 0x807   :  { %v2025_v19 = vmul.f32 %v2024_v63, %v4585_v22  ;;  %v2026_v3 = vmul.f32 %v2024_v63, %v4587_v10  ;;  %v4028_v22 = vld [vmem:[%s4778_s2] sm:$0xff]   ;;  %v4043_v63 = vld [vmem:[%s4778_s2 + $0xb8] sm:$0xff]  }
 0x808   :  { %v2017_v4 = vpop.f32.mrb[14].mxu0 }
 0x809   :  { %v2030_v8 = vrot.slane %v2017_v4, %v4356_v7  ;;  %v3586_v24 = vpop.f32.mrb[15].mxu0 }
 0x80b   :  { %v2031_v61 = vsub.f32 %v2025_v19, %v2030_v8  ;;  %v2032_v11 = vsub.f32 %v2026_v3, %v2030_v8  ;;  %v2328_v3 = vrot.slane %v2326_v57, 1 }
 0x80d   :  { %vm2033_vm5 = vcmp.ge.f32.partialorder %v2031_v61, 0.0  ;;  %vm2034_vm6 = vcmp.ge.f32.partialorder %v2032_v11, 0.0  ;;  %v2035_v14 = vmul.f32 0.2, %v2031_v61  ;;  %v2036_v16 = vmul.f32 0.2, %v2032_v11 }
 0x80f   :  { %v2037_v17 = vsel %vm2033_vm5, %v2031_v61, %v2035_v14  ;;  %v2038_v18 = vsel %vm2034_vm6, %v2032_v11, %v2036_v16 }
 0x810   :  { %v2977_v20 = vpack.c.bf16 %v2037_v17, %v2037_v17  ;;  %v2978_v21 = vpack.c.bf16 %v2038_v18, %v2038_v18 }
 0x812   :  { %2048 = vst [vmem:[#allocation3 + $0x14] sm:$0xf] %v2977_v20  ;;  %2049 = vst [vmem:[#allocation3 + $0x18] sm:$0xf] %v2978_v21 }
 0x819   :  { %v2051_v10 = vld [vmem:[#allocation3 + $0x14] sm:$0xf]  ;;  %v2052_v23 = vld [vmem:[#allocation3 + $0x18] sm:$0xf] }
 0x81a   :  { %v2922_v25 = vcombine.low %v2051_v10, %v2052_v23  ;;  %v2931_v29 = vcombine.low %v2050_v13, %v2051_v10  ;;  %v2932_v30 = vcombine.low %v2052_v23, %v2052_v23  ;;  %v4044_v55 = vld [vmem:[#allocation3 + $0x14] sm:$0xff]  }
 0x81b   :  { %v2321_v59 = vshll.u32 %v4044_v55, 16  ;;  %v2319_v1 = vshrl.u32 %v4044_v55, 16 }
 0x81c   :  { %3604 = vmatmul.mubr.bf16.vlgmr.msra.gmra.mrb[16].mxu0 %v2922_v25  ;;  %v2185_v35 = vshrl.u32 %v2931_v29, 16  ;;  %v2188_v32 = vshll.u32 %v2931_v29, 16  ;;  %v2193_v34 = vshrl.u32 %v2932_v30, 16  ;;  %v2196_v36 = vshll.u32 %v2932_v30, 16 }
 0x81d   :  { %3608 = vmatpush3.bf16.msra.mxu0 %v4028_v22  ;;  %3623 = vmatprep.mubr.msk.bf16.mxu0 %vm4056_vm0, %v4055_v0  ;;  %v2323_v62 = vrot.slane %v2321_v59, 1 }
 0x81e   :  { %3609 = vmatprep.subr.bf16.mxu0 %v4055_v0  ;;  %v2187_v38 = vrot.slane %v2185_v35, 3  ;;  %v2190_v39 = vrot.slane %v2188_v32, 4  ;;  %v2195_v40 = vrot.slane %v2193_v34, 3  ;;  %v2198_v42 = vrot.slane %v2196_v36, 4 }
 0x81f   :  { %v2324_v19 = vor.u32 %v2323_v62, %v2319_v1 }
 0x820   :  { %v2191_v45 = vor.u32 %v2190_v39, %v2187_v38  ;;  %v2199_v46 = vor.u32 %v2198_v42, %v2195_v40 }
 0x821   :  { %3610 = vmatpush3.bf16.msra.mxu0 %v4029_v26  ;;  %v2329_v4 = vsel %vm289_vm10, %v2324_v19, %v2328_v3 }
 0x822   :  { %3611 = vmatprep.subr.bf16.mxu0 %v4055_v0  ;;  %v2200_v50 = vsel %vm183_vm9, %v2191_v45, %v2199_v46 }
 0x825   :  { %3612 = vmatpush3.bf16.msra.mxu0 %v4030_v27 }
 0x826   :  { %3613 = vmatprep.subr.bf16.mxu0 %v4055_v0 }
 0x829   :  { %3614 = vmatpush3.bf16.msra.mxu0 %v4031_v28 }
 0x82a   :  { %3615 = vmatprep.subr.bf16.mxu0 %v4055_v0 }
 0x82d   :  { %3616 = vmatpush3.bf16.msra.mxu0 %v4032_v15 }
 0x82e   :  { %3617 = vmatprep.subr.bf16.mxu0 %v4055_v0 }
 0x831   :  { %3618 = vmatpush3.bf16.msra.mxu0 %v4033_v31 }
 0x832   :  { %3619 = vmatprep.subr.bf16.mxu0 %v4055_v0 }
 0x835   :  { %3620 = vmatpush3.bf16.msra.mxu0 %v4034_v37 }
 0x836   :  { %3621 = vmatprep.subr.bf16.mxu0 %v4055_v0 }
 0x839   :  { %3622 = vmatpush3.bf16.msra.mxu0 %v4035_v43 }
 0x83a   :  { %3627 = vmatprep.subr.bf16.mxu0 %v4055_v0 }
 0x83c   :  { %3624 = vmatmul.mubr.bf16.vlgmr.msra.gmra.mrb[16].mxu0 %v2200_v50 }
 0x83d   :  { %3628 = vmatpush3.bf16.msra.mxu0 %v4036_v49  ;;  %3643 = vmatprep.mubr.msk.bf16.mxu0 %vm4056_vm0, %v4055_v0 }
 0x83e   :  { %3629 = vmatprep.subr.bf16.mxu0 %v4055_v0 }
 0x841   :  { %3630 = vmatpush3.bf16.msra.mxu0 %v4037_v51 }
 0x842   :  { %3631 = vmatprep.subr.bf16.mxu0 %v4055_v0 }
 0x845   :  { %3632 = vmatpush3.bf16.msra.mxu0 %v4038_v52 }
 0x846   :  { %3633 = vmatprep.subr.bf16.mxu0 %v4055_v0 }
 0x849   :  { %3634 = vmatpush3.bf16.msra.mxu0 %v4039_v53 }
 0x84a   :  { %3635 = vmatprep.subr.bf16.mxu0 %v4055_v0 }
 0x84d   :  { %3636 = vmatpush3.bf16.msra.mxu0 %v4040_v54 }
 0x84e   :  { %3637 = vmatprep.subr.bf16.mxu0 %v4055_v0 }
 0x851   :  { %3638 = vmatpush3.bf16.msra.mxu0 %v4041_v56 }
 0x852   :  { %3639 = vmatprep.subr.bf16.mxu0 %v4055_v0 }
 0x855   :  { %3640 = vmatpush3.bf16.msra.mxu0 %v4042_v60 }
 0x856   :  { %3641 = vmatprep.subr.bf16.mxu0 %v4055_v0 }
 0x859   :  { %3642 = vmatpush3.bf16.msra.mxu0 %v4043_v63 }
 0x85c   :  { %3644 = vmatmul.mubr.bf16.vlgmr.msra.gmra.mrb[16].mxu0 %v2329_v4 }
 0x92f   :  { %v2413_v8 = vpop.f32.mrb[16].mxu0 }
 0x930   :  { %v3645_v24 = vpop.f32.mrb[17].mxu0  ;;  %v2429_v11 = vmul.f32 %v2413_v8, %v2413_v8 }
 0x931   :  { %v2416_v61 = vpop.f32.mrb[18].mxu0 }
 0x932   :  { %v2422_v14 = vadd.f32 %v2416_v61, %v2413_v8  ;;  %v2430_v16 = vmul.f32 %v2416_v61, %v2416_v61  ;;  %v3646_v17 = vpop.f32.mrb[19].mxu0 }
 0x934   :  { %v2423_v18 = vrot.slane %v2422_v14, 4  ;;  %v2431_v20 = vadd.f32 %v2430_v16, %v2429_v11 }
 0x936   :  { %v2424_v21 = vadd.f32 %v2423_v18, %v2422_v14  ;;  %v2432_v26 = vrot.slane %v2431_v20, 4 }
 0x938   :  { %v2425_v22 = vrot.slane %v2424_v21, 2  ;;  %v2433_v27 = vadd.f32 %v2432_v26, %v2431_v20 }
 0x93a   :  { %v2426_v10 = vadd.f32 %v2425_v22, %v2424_v21 }
 0x93c   :  { %v2427_v23 = vrot.slane %v2426_v10, 1 }
 0x93e   :  { %v2428_v25 = vadd.f32 %v2427_v23, %v2426_v10 }
 0x940   :  { %3680 = vmatmul.mubr.f32.vlgmr.msra.gmra.mrb[20].mxu1 %v2428_v25 }
 0x941   :  { %3897 = vmatpush3.bf16.msra.mxu1 %v4147_v33  ;;  %3714 = vmatprep.mubr.msk.f32.mxu1 %vm4056_vm0, %v4055_v0  ;;  %v2434_v33 = vrot.slane %v2433_v27, 2 }
 0x942   :  { %3898 = vmatprep.subr.bf16.mxu1 %v4057_v5 }
 0x945   :  { %3900 = vmatpush3.bf16.msra.mxu1 %v4160_v41  ;;  %v2435_v41 = vadd.f32 %v2434_v33, %v2433_v27 }
 0x946   :  { %3901 = vmatprep.subr.bf16.mxu1 %v4057_v5 }
 0x949   :  { %3903 = vmatpush3.bf16.msra.mxu1 %v4171_v44  ;;  %v2436_v44 = vrot.slane %v2435_v41, 1 }
 0x94a   :  { %3904 = vmatprep.subr.bf16.mxu1 %v4057_v5 }
 0x94d   :  { %3906 = vmatpush3.bf16.msra.mxu1 %v4179_v48  ;;  %v2437_v48 = vadd.f32 %v2436_v44, %v2435_v41 }
 0x94e   :  { %3907 = vmatprep.subr.bf16.mxu1 %v4057_v5 }
 0x951   :  { %3909 = vmatpush3.bf16.msra.mxu1 %v4215_v2 }
 0x952   :  { %3910 = vmatprep.subr.bf16.mxu1 %v4057_v5 }
 0x955   :  { %3912 = vmatpush3.bf16.msra.mxu1 %v4225_v6 }
 0x956   :  { %3913 = vmatprep.subr.bf16.mxu1 %v4057_v5 }
 0x959   :  { %3915 = vmatpush3.bf16.msra.mxu1 %v4235_v9 }
 0x95a   :  { %3916 = vmatprep.subr.bf16.mxu1 %v4057_v5 }
 0x95d   :  { %3918 = vmatpush3.bf16.msra.mxu1 %v4245_v12 }
 0x95e   :  { %3717 = vmatprep.subr.mxu1 %v4055_v0 }
 0x960   :  { %3715 = vmatmul.mubr.f32.vlgmr.msra.gmra.mrb[22].mxu1 %v2437_v48 }
 0x961   :  { %3718 = vmatpush3.msra.mxu1 %v4621_v47  ;;  %3719 = vmatprep.mubr.msk.f32.mxu1 %vm4056_vm0, %v4055_v0 }
 0x962   :  { %3722 = vmatprep.subr.mxu1 %v4055_v0 }
 0xa13   :  { %v2504_v2 = vpop.f32.mrb[20].mxu1 }
 0xa14   :  { %v3681_v6 = vpop.f32.mrb[21].mxu1  ;;  %v2578_v28 = vmul.f32 0.00390625, %v2504_v2 }
 0xa16   :  { %v2580_v13 = vmul.f32 %v2578_v28, %v2578_v28 }
 0xa33   :  { %v2574_v9 = vpop.f32.mrb[22].mxu1 }
 0xa34   :  { %v2579_v5 = vmul.f32 0.00390625, %v2574_v9  ;;  %v3716_v15 = vpop.f32.mrb[23].mxu1 }
 0xa36   :  { %v2581_v29 = vsub.f32 %v2579_v5, %v2580_v13 }
 0xa38   :  { %v2582_v12 = vmax.f32 %v2581_v29, 0.0 }
 0xa3a   :  { %v2583_v30 = vadd.f32 1e-05, %v2582_v12 }
 0xa3c   :  { %4052 = vrsqrt.f32 %v2583_v30 }
 0xa46   :  { %v4053_v31 = vpop.eup %4052 }
 0xa47   :  { %3720 = vmatmul.mubr.msk.f32.vlgmr.msra.gmra.mrb[24].mxu1 %vm536_vm11, %v4053_v31  ;;  %v2585_v35 = vmul.f32 %v4053_v31, %v2578_v28 }
 0xa48   :  { %3723 = vmatpush3.msra.mxu1 %v4621_v47  ;;  %3724 = vmatprep.mubr.msk.f32.mxu1 %vm4056_vm0, %v4055_v0 }
 0xa4b   :  { %3725 = vmatmul.mubr.msk.f32.vlgmr.msra.gmra.mrb[26].mxu1 %vm536_vm11, %v2585_v35 }
 0xb1a   :  { %v2655_v32 = vpop.f32.mrb[24].mxu1 }
 0xb1b   :  { %v2735_v34 = vrot.slane %v2655_v32, %v4356_v7  ;;  %v3721_v36 = vpop.f32.mrb[25].mxu1 }
 0xb1d   :  { %v2736_v37 = vmul.f32 %v2735_v34, %v2413_v8  ;;  %v2737_v38 = vmul.f32 %v2735_v34, %v2416_v61 }
 0xb1e   :  { %v2728_v39 = vpop.f32.mrb[26].mxu1 }
 0xb1f   :  { %v2741_v40 = vrot.slane %v2728_v39, %v4356_v7  ;;  %v3726_v42 = vpop.f32.mrb[27].mxu1 }
 0xb21   :  { %v2742_v43 = vsub.f32 %v2736_v37, %v2741_v40  ;;  %v2743_v45 = vsub.f32 %v2737_v38, %v2741_v40 }
 0xb23   :  { %vm2744_vm7 = vcmp.ge.f32.partialorder %v2742_v43, 0.0  ;;  %vm2745_vm8 = vcmp.ge.f32.partialorder %v2743_v45, 0.0  ;;  %v2746_v47 = vmul.f32 0.2, %v2742_v43  ;;  %v2747_v46 = vmul.f32 0.2, %v2743_v45 }
 0xb25   :  { %v2748_v49 = vsel %vm2744_vm7, %v2742_v43, %v2746_v47  ;;  %v2749_v0 = vsel %vm2745_vm8, %v2743_v45, %v2747_v46 }
 0xb26   :  { %2969 = vst [vmem:[%s4779_s5 + $0x10] sm:$0xff] %v2748_v49  ;;  %2970 = vst [vmem:[%s4779_s5 + $0x18] sm:$0xff] %v2749_v0 }

</bundles_post_ra>
